<compile_context>
chip_gen: v5e
topology: v5e:2x2
jax: 0.10.0
libtpu: 0.0.40
codegen_flags: <defaults>
</compile_context>

<pallas_src>
import functools

import jax
import jax.numpy as jnp
from jax.experimental import pallas as pl
from jax.experimental.pallas import tpu as pltpu


def _conv3x3_bn_relu(x, w_ref, b_ref, mask_ref, width):
    """3x3 'same' conv + folded BN + ReLU on a lane-dense (Cin, H*W) plane.

    x:        (Cin, H*W) f32 value.
    w_ref:    (Cout, Cin*9) VMEM ref; BN scale already folded in; column index
              = ci*9 + ky*3 + kx (OIHW weight flattened over its last 3 dims).
    b_ref:    (Cout, 1) VMEM ref, folded BN shift.
    mask_ref: (9, H*W) VMEM ref of {0,1} boundary masks, one per tap.
    """
    cin, hw = x.shape
    cout = w_ref.shape[0]
    acc = jnp.zeros((cout, hw), jnp.float32)
    for ky in range(3):
        for kx in range(3):
            k = ky * 3 + kx
            s = (ky - 1) * width + (kx - 1)       # flat source offset of tap
            if s == 0:
                xs = x                            # center tap: no shift, mask==1
            else:
                # xs[c, p] = x[c, p + s]; out-of-image sources zeroed by mask.
                xs = pltpu.roll(x, (-s) % hw, axis=1) * mask_ref[k:k + 1, :]
            for ci in range(cin):
                j = ci * 9 + k
                wcol = w_ref[:, j:j + 1]              # (Cout, 1) tap weights
                acc = acc + wcol * xs[ci:ci + 1, :]   # broadcast MAC over Cout
    return jnp.maximum(acc + b_ref[...], 0.0)


def _double_conv_kernel(x_ref, w1_ref, b1_ref, w2_ref, b2_ref, mask_ref,
                        o_ref, *, width):
    # x_ref: (1, Cin, H*W) VMEM block (one image); o_ref: (1, Cout, H*W).
    x = x_ref[0].astype(jnp.float32)                           # (Cin,  H*W)
    h = _conv3x3_bn_relu(x, w1_ref, b1_ref, mask_ref, width)   # (Cmid, H*W)
    y = _conv3x3_bn_relu(h, w2_ref, b2_ref, mask_ref, width)   # (Cout, H*W)
    o_ref[0] = y.astype(o_ref.dtype)


def double_conv(x, w1, gamma1, beta1, mean1, var1,
                w2, gamma2, beta2, mean2, var2, *, eps=1e-5):
    """Fused DoubleConv forward (inference-mode BatchNorm folded into weights).

    x:  (N, Cin, H, W) NCHW activations.
    w1: (Cmid, Cin, 3, 3), w2: (Cout, Cmid, 3, 3)  (no conv bias, per the spec).
    Returns (N, Cout, H, W).
    """
    N, Cin, H, W = x.shape
    Cmid = w1.shape[0]
    Cout = w2.shape[0]
    HW = H * W

    # Fold inference BatchNorm into the conv weights / per-channel shifts.
    s1 = (gamma1 / jnp.sqrt(var1 + eps)).astype(jnp.float32)
    b1 = (beta1 - mean1 * s1).astype(jnp.float32).reshape(Cmid, 1)
    s2 = (gamma2 / jnp.sqrt(var2 + eps)).astype(jnp.float32)
    b2 = (beta2 - mean2 * s2).astype(jnp.float32).reshape(Cout, 1)
    w1f = (w1.astype(jnp.float32) * s1[:, None, None, None]).reshape(Cmid, Cin * 9)
    w2f = (w2.astype(jnp.float32) * s2[:, None, None, None]).reshape(Cout, Cmid * 9)

    # Boundary masks for the 9 taps of a padding=1 'same' conv, flat layout.
    yy = jnp.arange(H)[:, None]
    xx = jnp.arange(W)[None, :]
    masks = []
    for ky in range(3):
        for kx in range(3):
            dy, dx = ky - 1, kx - 1
            valid = ((yy + dy >= 0) & (yy + dy < H) &
                     (xx + dx >= 0) & (xx + dx < W))
            masks.append(valid.reshape(HW))
    mask = jnp.stack(masks).astype(jnp.float32)                # (9, H*W)

    x3 = x.reshape(N, Cin, HW)                                 # free reshape

    flops = 2 * N * HW * 9 * (Cin * Cmid + Cmid * Cout)
    bytes_accessed = 4 * (N * HW * (Cin + Cout) + w1f.size + w2f.size
                          + b1.size + b2.size + mask.size)

    def const_spec(shape):
        return pl.BlockSpec(shape, lambda n: (0, 0))

    out3 = pl.pallas_call(
        functools.partial(_double_conv_kernel, width=W),
        out_shape=jax.ShapeDtypeStruct((N, Cout, HW), x.dtype),
        grid_spec=pltpu.PrefetchScalarGridSpec(
            num_scalar_prefetch=0,
            grid=(N,),
            in_specs=[
                pl.BlockSpec((1, Cin, HW), lambda n: (n, 0, 0)),
                const_spec((Cmid, Cin * 9)),   # BN-folded conv1 weights
                const_spec((Cmid, 1)),         # BN1 shift
                const_spec((Cout, Cmid * 9)),  # BN-folded conv2 weights
                const_spec((Cout, 1)),         # BN2 shift
                const_spec((9, HW)),           # boundary masks
            ],
            out_specs=pl.BlockSpec((1, Cout, HW), lambda n: (n, 0, 0)),
        ),
        compiler_params=pltpu.CompilerParams(
            dimension_semantics=("parallel",),
            vmem_limit_bytes=32 * 1024 * 1024,
        ),
        cost_estimate=pl.CostEstimate(
            flops=flops, transcendentals=0, bytes_accessed=bytes_accessed),
    )(x3, w1f, b1, w2f, b2, mask)

    return out3.reshape(N, Cout, H, W)


if __name__ == "__main__":
    key = jax.random.PRNGKey(0)
    ks = jax.random.split(key, 11)

    N, Cin, H, W = 2, 4, 16, 16
    Cout = 6
    Cmid = Cout  # DoubleConv default: mid_channels = out_channels

    x = jax.random.normal(ks[0], (N, Cin, H, W), dtype=jnp.float32)

    bound1 = 1.0 / ((Cin * 9) ** 0.5)
    w1 = jax.random.uniform(ks[1], (Cmid, Cin, 3, 3), minval=-bound1,
                            maxval=bound1, dtype=jnp.float32)
    gamma1 = jax.random.uniform(ks[2], (Cmid,), minval=0.5, maxval=1.5,
                                dtype=jnp.float32)
    beta1 = 0.1 * jax.random.normal(ks[3], (Cmid,), dtype=jnp.float32)
    mean1 = 0.1 * jax.random.normal(ks[4], (Cmid,), dtype=jnp.float32)
    var1 = jax.random.uniform(ks[5], (Cmid,), minval=0.5, maxval=1.5,
                              dtype=jnp.float32)

    bound2 = 1.0 / ((Cmid * 9) ** 0.5)
    w2 = jax.random.uniform(ks[6], (Cout, Cmid, 3, 3), minval=-bound2,
                            maxval=bound2, dtype=jnp.float32)
    gamma2 = jax.random.uniform(ks[7], (Cout,), minval=0.5, maxval=1.5,
                                dtype=jnp.float32)
    beta2 = 0.1 * jax.random.normal(ks[8], (Cout,), dtype=jnp.float32)
    mean2 = 0.1 * jax.random.normal(ks[9], (Cout,), dtype=jnp.float32)
    var2 = jax.random.uniform(ks[10], (Cout,), minval=0.5, maxval=1.5,
                              dtype=jnp.float32)

    y = double_conv(x, w1, gamma1, beta1, mean1, var1,
                    w2, gamma2, beta2, mean2, var2)
    y = jax.block_until_ready(y)

    # Pure-JAX reference: conv3x3(pad=1) -> BN(inference) -> ReLU, twice.
    def conv3x3(z, w):
        return jax.lax.conv_general_dilated(
            z, w, window_strides=(1, 1), padding=((1, 1), (1, 1)),
            dimension_numbers=("NCHW", "OIHW", "NCHW"))

    def bn(z, g, b, m, v):
        inv = g / jnp.sqrt(v + 1e-5)
        return z * inv[None, :, None, None] + (b - m * inv)[None, :, None, None]

    ref = jax.nn.relu(bn(conv3x3(x, w1), gamma1, beta1, mean1, var1))
    ref = jax.nn.relu(bn(conv3x3(ref, w2), gamma2, beta2, mean2, var2))

    assert y.shape == (N, Cout, H, W)
    max_err = float(jnp.max(jnp.abs(y - ref)))
    assert jnp.allclose(y, ref, atol=1e-4, rtol=1e-4), f"max_err={max_err}"

    print("KERNEL_OK")
</pallas_src>

<mosaic_0001>
module attributes {stable_mosaic.version = 11 : i64} {
  func.func @_double_conv_kernel(%arg0: i32, %arg1: memref<1x4x256xf32, #tpu.memory_space<vmem>>, %arg2: memref<6x36xf32, #tpu.memory_space<vmem>>, %arg3: memref<6x1xf32, #tpu.memory_space<vmem>>, %arg4: memref<6x54xf32, #tpu.memory_space<vmem>>, %arg5: memref<6x1xf32, #tpu.memory_space<vmem>>, %arg6: memref<9x256xf32, #tpu.memory_space<vmem>>, %arg7: memref<1x6x256xf32, #tpu.memory_space<vmem>>) attributes {dimension_semantics = [#tpu.dimension_semantics<parallel>], iteration_bounds = array<i64: 2>, scalar_prefetch = 0 : i64, scratch_operands = 0 : i64, tpu.core_type = #tpu.core_type<tc>, window_params = [{transform_indices = @transform_0, window_bounds = array<i64: 1, 4, 256>}, {pipeline_mode = #tpu.pipeline_mode<synchronous>, transform_indices = @transform_1, window_bounds = array<i64: 6, 36>}, {pipeline_mode = #tpu.pipeline_mode<synchronous>, transform_indices = @transform_2, window_bounds = array<i64: 6, 1>}, {pipeline_mode = #tpu.pipeline_mode<synchronous>, transform_indices = @transform_3, window_bounds = array<i64: 6, 54>}, {pipeline_mode = #tpu.pipeline_mode<synchronous>, transform_indices = @transform_4, window_bounds = array<i64: 6, 1>}, {pipeline_mode = #tpu.pipeline_mode<synchronous>, transform_indices = @transform_5, window_bounds = array<i64: 9, 256>}, {transform_indices = @transform_6, window_bounds = array<i64: 1, 6, 256>}]} {
    %c0 = arith.constant 0 : index
    %c0_0 = arith.constant 0 : index
    %c0_1 = arith.constant 0 : index
    %0 = vector.load %arg1[%c0, %c0_0, %c0_1] : memref<1x4x256xf32, #tpu.memory_space<vmem>>, vector<1x4x256xf32>
    %1 = vector.shape_cast %0 : vector<1x4x256xf32> to vector<4x256xf32>
    %cst = arith.constant 0.000000e+00 : f32
    %2 = vector.broadcast %cst : f32 to vector<6x256xf32>
    %c17_i32 = arith.constant 17 : i32
    %3 = tpu.dynamic_rotate %1 by %c17_i32 dim 1 : vector<4x256xf32>, i32 -> vector<4x256xf32>
    %c0_2 = arith.constant 0 : index
    %c0_3 = arith.constant 0 : index
    %4 = vector.load %arg6[%c0_2, %c0_3] : memref<9x256xf32, #tpu.memory_space<vmem>>, vector<1x256xf32>
    %5 = vector.broadcast %4 : vector<1x256xf32> to vector<4x256xf32>
    %6 = arith.mulf %3, %5 : vector<4x256xf32>
    %c0_4 = arith.constant 0 : index
    %c0_5 = arith.constant 0 : index
    %7 = vector.load %arg2[%c0_4, %c0_5] : memref<6x36xf32, #tpu.memory_space<vmem>>, vector<6x1xf32>
    %8 = vector.extract_strided_slice %6 {offsets = [0, 0], sizes = [1, 256], strides = [1, 1]} : vector<4x256xf32> to vector<1x256xf32>
    %9 = vector.broadcast %7 : vector<6x1xf32> to vector<6x256xf32>
    %10 = vector.broadcast %8 : vector<1x256xf32> to vector<6x256xf32>
    %11 = arith.mulf %9, %10 : vector<6x256xf32>
    %12 = arith.addf %2, %11 : vector<6x256xf32>
    %c0_6 = arith.constant 0 : index
    %c9 = arith.constant 9 : index
    %13 = vector.load %arg2[%c0_6, %c9] : memref<6x36xf32, #tpu.memory_space<vmem>>, vector<6x1xf32>
    %14 = vector.extract_strided_slice %6 {offsets = [1, 0], sizes = [1, 256], strides = [1, 1]} : vector<4x256xf32> to vector<1x256xf32>
    %15 = vector.broadcast %13 : vector<6x1xf32> to vector<6x256xf32>
    %16 = vector.broadcast %14 : vector<1x256xf32> to vector<6x256xf32>
    %17 = arith.mulf %15, %16 : vector<6x256xf32>
    %18 = arith.addf %12, %17 : vector<6x256xf32>
    %c0_7 = arith.constant 0 : index
    %c18 = arith.constant 18 : index
    %19 = vector.load %arg2[%c0_7, %c18] : memref<6x36xf32, #tpu.memory_space<vmem>>, vector<6x1xf32>
    %20 = vector.extract_strided_slice %6 {offsets = [2, 0], sizes = [1, 256], strides = [1, 1]} : vector<4x256xf32> to vector<1x256xf32>
    %21 = vector.broadcast %19 : vector<6x1xf32> to vector<6x256xf32>
    %22 = vector.broadcast %20 : vector<1x256xf32> to vector<6x256xf32>
    %23 = arith.mulf %21, %22 : vector<6x256xf32>
    %24 = arith.addf %18, %23 : vector<6x256xf32>
    %c0_8 = arith.constant 0 : index
    %c27 = arith.constant 27 : index
    %25 = vector.load %arg2[%c0_8, %c27] : memref<6x36xf32, #tpu.memory_space<vmem>>, vector<6x1xf32>
    %26 = vector.extract_strided_slice %6 {offsets = [3, 0], sizes = [1, 256], strides = [1, 1]} : vector<4x256xf32> to vector<1x256xf32>
    %27 = vector.broadcast %25 : vector<6x1xf32> to vector<6x256xf32>
    %28 = vector.broadcast %26 : vector<1x256xf32> to vector<6x256xf32>
    %29 = arith.mulf %27, %28 : vector<6x256xf32>
    %30 = arith.addf %24, %29 : vector<6x256xf32>
    %c16_i32 = arith.constant 16 : i32
    %31 = tpu.dynamic_rotate %1 by %c16_i32 dim 1 : vector<4x256xf32>, i32 -> vector<4x256xf32>
    %c1 = arith.constant 1 : index
    %c0_9 = arith.constant 0 : index
    %32 = vector.load %arg6[%c1, %c0_9] : memref<9x256xf32, #tpu.memory_space<vmem>>, vector<1x256xf32>
    %33 = vector.broadcast %32 : vector<1x256xf32> to vector<4x256xf32>
    %34 = arith.mulf %31, %33 : vector<4x256xf32>
    %c0_10 = arith.constant 0 : index
    %c1_11 = arith.constant 1 : index
    %35 = vector.load %arg2[%c0_10, %c1_11] : memref<6x36xf32, #tpu.memory_space<vmem>>, vector<6x1xf32>
    %36 = vector.extract_strided_slice %34 {offsets = [0, 0], sizes = [1, 256], strides = [1, 1]} : vector<4x256xf32> to vector<1x256xf32>
    %37 = vector.broadcast %35 : vector<6x1xf32> to vector<6x256xf32>
    %38 = vector.broadcast %36 : vector<1x256xf32> to vector<6x256xf32>
    %39 = arith.mulf %37, %38 : vector<6x256xf32>
    %40 = arith.addf %30, %39 : vector<6x256xf32>
    %c0_12 = arith.constant 0 : index
    %c10 = arith.constant 10 : index
    %41 = vector.load %arg2[%c0_12, %c10] : memref<6x36xf32, #tpu.memory_space<vmem>>, vector<6x1xf32>
    %42 = vector.extract_strided_slice %34 {offsets = [1, 0], sizes = [1, 256], strides = [1, 1]} : vector<4x256xf32> to vector<1x256xf32>
    %43 = vector.broadcast %41 : vector<6x1xf32> to vector<6x256xf32>
    %44 = vector.broadcast %42 : vector<1x256xf32> to vector<6x256xf32>
    %45 = arith.mulf %43, %44 : vector<6x256xf32>
    %46 = arith.addf %40, %45 : vector<6x256xf32>
    %c0_13 = arith.constant 0 : index
    %c19 = arith.constant 19 : index
    %47 = vector.load %arg2[%c0_13, %c19] : memref<6x36xf32, #tpu.memory_space<vmem>>, vector<6x1xf32>
    %48 = vector.extract_strided_slice %34 {offsets = [2, 0], sizes = [1, 256], strides = [1, 1]} : vector<4x256xf32> to vector<1x256xf32>
    %49 = vector.broadcast %47 : vector<6x1xf32> to vector<6x256xf32>
    %50 = vector.broadcast %48 : vector<1x256xf32> to vector<6x256xf32>
    %51 = arith.mulf %49, %50 : vector<6x256xf32>
    %52 = arith.addf %46, %51 : vector<6x256xf32>
    %c0_14 = arith.constant 0 : index
    %c28 = arith.constant 28 : index
    %53 = vector.load %arg2[%c0_14, %c28] : memref<6x36xf32, #tpu.memory_space<vmem>>, vector<6x1xf32>
    %54 = vector.extract_strided_slice %34 {offsets = [3, 0], sizes = [1, 256], strides = [1, 1]} : vector<4x256xf32> to vector<1x256xf32>
    %55 = vector.broadcast %53 : vector<6x1xf32> to vector<6x256xf32>
    %56 = vector.broadcast %54 : vector<1x256xf32> to vector<6x256xf32>
    %57 = arith.mulf %55, %56 : vector<6x256xf32>
    %58 = arith.addf %52, %57 : vector<6x256xf32>
    %c15_i32 = arith.constant 15 : i32
    %59 = tpu.dynamic_rotate %1 by %c15_i32 dim 1 : vector<4x256xf32>, i32 -> vector<4x256xf32>
    %c2 = arith.constant 2 : index
    %c0_15 = arith.constant 0 : index
    %60 = vector.load %arg6[%c2, %c0_15] : memref<9x256xf32, #tpu.memory_space<vmem>>, vector<1x256xf32>
    %61 = vector.broadcast %60 : vector<1x256xf32> to vector<4x256xf32>
    %62 = arith.mulf %59, %61 : vector<4x256xf32>
    %c0_16 = arith.constant 0 : index
    %c2_17 = arith.constant 2 : index
    %63 = vector.load %arg2[%c0_16, %c2_17] : memref<6x36xf32, #tpu.memory_space<vmem>>, vector<6x1xf32>
    %64 = vector.extract_strided_slice %62 {offsets = [0, 0], sizes = [1, 256], strides = [1, 1]} : vector<4x256xf32> to vector<1x256xf32>
    %65 = vector.broadcast %63 : vector<6x1xf32> to vector<6x256xf32>
    %66 = vector.broadcast %64 : vector<1x256xf32> to vector<6x256xf32>
    %67 = arith.mulf %65, %66 : vector<6x256xf32>
    %68 = arith.addf %58, %67 : vector<6x256xf32>
    %c0_18 = arith.constant 0 : index
    %c11 = arith.constant 11 : index
    %69 = vector.load %arg2[%c0_18, %c11] : memref<6x36xf32, #tpu.memory_space<vmem>>, vector<6x1xf32>
    %70 = vector.extract_strided_slice %62 {offsets = [1, 0], sizes = [1, 256], strides = [1, 1]} : vector<4x256xf32> to vector<1x256xf32>
    %71 = vector.broadcast %69 : vector<6x1xf32> to vector<6x256xf32>
    %72 = vector.broadcast %70 : vector<1x256xf32> to vector<6x256xf32>
    %73 = arith.mulf %71, %72 : vector<6x256xf32>
    %74 = arith.addf %68, %73 : vector<6x256xf32>
    %c0_19 = arith.constant 0 : index
    %c20 = arith.constant 20 : index
    %75 = vector.load %arg2[%c0_19, %c20] : memref<6x36xf32, #tpu.memory_space<vmem>>, vector<6x1xf32>
    %76 = vector.extract_strided_slice %62 {offsets = [2, 0], sizes = [1, 256], strides = [1, 1]} : vector<4x256xf32> to vector<1x256xf32>
    %77 = vector.broadcast %75 : vector<6x1xf32> to vector<6x256xf32>
    %78 = vector.broadcast %76 : vector<1x256xf32> to vector<6x256xf32>
    %79 = arith.mulf %77, %78 : vector<6x256xf32>
    %80 = arith.addf %74, %79 : vector<6x256xf32>
    %c0_20 = arith.constant 0 : index
    %c29 = arith.constant 29 : index
    %81 = vector.load %arg2[%c0_20, %c29] : memref<6x36xf32, #tpu.memory_space<vmem>>, vector<6x1xf32>
    %82 = vector.extract_strided_slice %62 {offsets = [3, 0], sizes = [1, 256], strides = [1, 1]} : vector<4x256xf32> to vector<1x256xf32>
    %83 = vector.broadcast %81 : vector<6x1xf32> to vector<6x256xf32>
    %84 = vector.broadcast %82 : vector<1x256xf32> to vector<6x256xf32>
    %85 = arith.mulf %83, %84 : vector<6x256xf32>
    %86 = arith.addf %80, %85 : vector<6x256xf32>
    %c1_i32 = arith.constant 1 : i32
    %87 = tpu.dynamic_rotate %1 by %c1_i32 dim 1 : vector<4x256xf32>, i32 -> vector<4x256xf32>
    %c3 = arith.constant 3 : index
    %c0_21 = arith.constant 0 : index
    %88 = vector.load %arg6[%c3, %c0_21] : memref<9x256xf32, #tpu.memory_space<vmem>>, vector<1x256xf32>
    %89 = vector.broadcast %88 : vector<1x256xf32> to vector<4x256xf32>
    %90 = arith.mulf %87, %89 : vector<4x256xf32>
    %c0_22 = arith.constant 0 : index
    %c3_23 = arith.constant 3 : index
    %91 = vector.load %arg2[%c0_22, %c3_23] : memref<6x36xf32, #tpu.memory_space<vmem>>, vector<6x1xf32>
    %92 = vector.extract_strided_slice %90 {offsets = [0, 0], sizes = [1, 256], strides = [1, 1]} : vector<4x256xf32> to vector<1x256xf32>
    %93 = vector.broadcast %91 : vector<6x1xf32> to vector<6x256xf32>
    %94 = vector.broadcast %92 : vector<1x256xf32> to vector<6x256xf32>
    %95 = arith.mulf %93, %94 : vector<6x256xf32>
    %96 = arith.addf %86, %95 : vector<6x256xf32>
    %c0_24 = arith.constant 0 : index
    %c12 = arith.constant 12 : index
    %97 = vector.load %arg2[%c0_24, %c12] : memref<6x36xf32, #tpu.memory_space<vmem>>, vector<6x1xf32>
    %98 = vector.extract_strided_slice %90 {offsets = [1, 0], sizes = [1, 256], strides = [1, 1]} : vector<4x256xf32> to vector<1x256xf32>
    %99 = vector.broadcast %97 : vector<6x1xf32> to vector<6x256xf32>
    %100 = vector.broadcast %98 : vector<1x256xf32> to vector<6x256xf32>
    %101 = arith.mulf %99, %100 : vector<6x256xf32>
    %102 = arith.addf %96, %101 : vector<6x256xf32>
    %c0_25 = arith.constant 0 : index
    %c21 = arith.constant 21 : index
    %103 = vector.load %arg2[%c0_25, %c21] : memref<6x36xf32, #tpu.memory_space<vmem>>, vector<6x1xf32>
    %104 = vector.extract_strided_slice %90 {offsets = [2, 0], sizes = [1, 256], strides = [1, 1]} : vector<4x256xf32> to vector<1x256xf32>
    %105 = vector.broadcast %103 : vector<6x1xf32> to vector<6x256xf32>
    %106 = vector.broadcast %104 : vector<1x256xf32> to vector<6x256xf32>
    %107 = arith.mulf %105, %106 : vector<6x256xf32>
    %108 = arith.addf %102, %107 : vector<6x256xf32>
    %c0_26 = arith.constant 0 : index
    %c30 = arith.constant 30 : index
    %109 = vector.load %arg2[%c0_26, %c30] : memref<6x36xf32, #tpu.memory_space<vmem>>, vector<6x1xf32>
    %110 = vector.extract_strided_slice %90 {offsets = [3, 0], sizes = [1, 256], strides = [1, 1]} : vector<4x256xf32> to vector<1x256xf32>
    %111 = vector.broadcast %109 : vector<6x1xf32> to vector<6x256xf32>
    %112 = vector.broadcast %110 : vector<1x256xf32> to vector<6x256xf32>
    %113 = arith.mulf %111, %112 : vector<6x256xf32>
    %114 = arith.addf %108, %113 : vector<6x256xf32>
    %c0_27 = arith.constant 0 : index
    %c4 = arith.constant 4 : index
    %115 = vector.load %arg2[%c0_27, %c4] : memref<6x36xf32, #tpu.memory_space<vmem>>, vector<6x1xf32>
    %116 = vector.extract_strided_slice %1 {offsets = [0, 0], sizes = [1, 256], strides = [1, 1]} : vector<4x256xf32> to vector<1x256xf32>
    %117 = vector.broadcast %115 : vector<6x1xf32> to vector<6x256xf32>
    %118 = vector.broadcast %116 : vector<1x256xf32> to vector<6x256xf32>
    %119 = arith.mulf %117, %118 : vector<6x256xf32>
    %120 = arith.addf %114, %119 : vector<6x256xf32>
    %c0_28 = arith.constant 0 : index
    %c13 = arith.constant 13 : index
    %121 = vector.load %arg2[%c0_28, %c13] : memref<6x36xf32, #tpu.memory_space<vmem>>, vector<6x1xf32>
    %122 = vector.extract_strided_slice %1 {offsets = [1, 0], sizes = [1, 256], strides = [1, 1]} : vector<4x256xf32> to vector<1x256xf32>
    %123 = vector.broadcast %121 : vector<6x1xf32> to vector<6x256xf32>
    %124 = vector.broadcast %122 : vector<1x256xf32> to vector<6x256xf32>
    %125 = arith.mulf %123, %124 : vector<6x256xf32>
    %126 = arith.addf %120, %125 : vector<6x256xf32>
    %c0_29 = arith.constant 0 : index
    %c22 = arith.constant 22 : index
    %127 = vector.load %arg2[%c0_29, %c22] : memref<6x36xf32, #tpu.memory_space<vmem>>, vector<6x1xf32>
    %128 = vector.extract_strided_slice %1 {offsets = [2, 0], sizes = [1, 256], strides = [1, 1]} : vector<4x256xf32> to vector<1x256xf32>
    %129 = vector.broadcast %127 : vector<6x1xf32> to vector<6x256xf32>
    %130 = vector.broadcast %128 : vector<1x256xf32> to vector<6x256xf32>
    %131 = arith.mulf %129, %130 : vector<6x256xf32>
    %132 = arith.addf %126, %131 : vector<6x256xf32>
    %c0_30 = arith.constant 0 : index
    %c31 = arith.constant 31 : index
    %133 = vector.load %arg2[%c0_30, %c31] : memref<6x36xf32, #tpu.memory_space<vmem>>, vector<6x1xf32>
    %134 = vector.extract_strided_slice %1 {offsets = [3, 0], sizes = [1, 256], strides = [1, 1]} : vector<4x256xf32> to vector<1x256xf32>
    %135 = vector.broadcast %133 : vector<6x1xf32> to vector<6x256xf32>
    %136 = vector.broadcast %134 : vector<1x256xf32> to vector<6x256xf32>
    %137 = arith.mulf %135, %136 : vector<6x256xf32>
    %138 = arith.addf %132, %137 : vector<6x256xf32>
    %c255_i32 = arith.constant 255 : i32
    %139 = tpu.dynamic_rotate %1 by %c255_i32 dim 1 : vector<4x256xf32>, i32 -> vector<4x256xf32>
    %c5 = arith.constant 5 : index
    %c0_31 = arith.constant 0 : index
    %140 = vector.load %arg6[%c5, %c0_31] : memref<9x256xf32, #tpu.memory_space<vmem>>, vector<1x256xf32>
    %141 = vector.broadcast %140 : vector<1x256xf32> to vector<4x256xf32>
    %142 = arith.mulf %139, %141 : vector<4x256xf32>
    %c0_32 = arith.constant 0 : index
    %c5_33 = arith.constant 5 : index
    %143 = vector.load %arg2[%c0_32, %c5_33] : memref<6x36xf32, #tpu.memory_space<vmem>>, vector<6x1xf32>
    %144 = vector.extract_strided_slice %142 {offsets = [0, 0], sizes = [1, 256], strides = [1, 1]} : vector<4x256xf32> to vector<1x256xf32>
    %145 = vector.broadcast %143 : vector<6x1xf32> to vector<6x256xf32>
    %146 = vector.broadcast %144 : vector<1x256xf32> to vector<6x256xf32>
    %147 = arith.mulf %145, %146 : vector<6x256xf32>
    %148 = arith.addf %138, %147 : vector<6x256xf32>
    %c0_34 = arith.constant 0 : index
    %c14 = arith.constant 14 : index
    %149 = vector.load %arg2[%c0_34, %c14] : memref<6x36xf32, #tpu.memory_space<vmem>>, vector<6x1xf32>
    %150 = vector.extract_strided_slice %142 {offsets = [1, 0], sizes = [1, 256], strides = [1, 1]} : vector<4x256xf32> to vector<1x256xf32>
    %151 = vector.broadcast %149 : vector<6x1xf32> to vector<6x256xf32>
    %152 = vector.broadcast %150 : vector<1x256xf32> to vector<6x256xf32>
    %153 = arith.mulf %151, %152 : vector<6x256xf32>
    %154 = arith.addf %148, %153 : vector<6x256xf32>
    %c0_35 = arith.constant 0 : index
    %c23 = arith.constant 23 : index
    %155 = vector.load %arg2[%c0_35, %c23] : memref<6x36xf32, #tpu.memory_space<vmem>>, vector<6x1xf32>
    %156 = vector.extract_strided_slice %142 {offsets = [2, 0], sizes = [1, 256], strides = [1, 1]} : vector<4x256xf32> to vector<1x256xf32>
    %157 = vector.broadcast %155 : vector<6x1xf32> to vector<6x256xf32>
    %158 = vector.broadcast %156 : vector<1x256xf32> to vector<6x256xf32>
    %159 = arith.mulf %157, %158 : vector<6x256xf32>
    %160 = arith.addf %154, %159 : vector<6x256xf32>
    %c0_36 = arith.constant 0 : index
    %c32 = arith.constant 32 : index
    %161 = vector.load %arg2[%c0_36, %c32] : memref<6x36xf32, #tpu.memory_space<vmem>>, vector<6x1xf32>
    %162 = vector.extract_strided_slice %142 {offsets = [3, 0], sizes = [1, 256], strides = [1, 1]} : vector<4x256xf32> to vector<1x256xf32>
    %163 = vector.broadcast %161 : vector<6x1xf32> to vector<6x256xf32>
    %164 = vector.broadcast %162 : vector<1x256xf32> to vector<6x256xf32>
    %165 = arith.mulf %163, %164 : vector<6x256xf32>
    %166 = arith.addf %160, %165 : vector<6x256xf32>
    %c241_i32 = arith.constant 241 : i32
    %167 = tpu.dynamic_rotate %1 by %c241_i32 dim 1 : vector<4x256xf32>, i32 -> vector<4x256xf32>
    %c6 = arith.constant 6 : index
    %c0_37 = arith.constant 0 : index
    %168 = vector.load %arg6[%c6, %c0_37] : memref<9x256xf32, #tpu.memory_space<vmem>>, vector<1x256xf32>
    %169 = vector.broadcast %168 : vector<1x256xf32> to vector<4x256xf32>
    %170 = arith.mulf %167, %169 : vector<4x256xf32>
    %c0_38 = arith.constant 0 : index
    %c6_39 = arith.constant 6 : index
    %171 = vector.load %arg2[%c0_38, %c6_39] : memref<6x36xf32, #tpu.memory_space<vmem>>, vector<6x1xf32>
    %172 = vector.extract_strided_slice %170 {offsets = [0, 0], sizes = [1, 256], strides = [1, 1]} : vector<4x256xf32> to vector<1x256xf32>
    %173 = vector.broadcast %171 : vector<6x1xf32> to vector<6x256xf32>
    %174 = vector.broadcast %172 : vector<1x256xf32> to vector<6x256xf32>
    %175 = arith.mulf %173, %174 : vector<6x256xf32>
    %176 = arith.addf %166, %175 : vector<6x256xf32>
    %c0_40 = arith.constant 0 : index
    %c15 = arith.constant 15 : index
    %177 = vector.load %arg2[%c0_40, %c15] : memref<6x36xf32, #tpu.memory_space<vmem>>, vector<6x1xf32>
    %178 = vector.extract_strided_slice %170 {offsets = [1, 0], sizes = [1, 256], strides = [1, 1]} : vector<4x256xf32> to vector<1x256xf32>
    %179 = vector.broadcast %177 : vector<6x1xf32> to vector<6x256xf32>
    %180 = vector.broadcast %178 : vector<1x256xf32> to vector<6x256xf32>
    %181 = arith.mulf %179, %180 : vector<6x256xf32>
    %182 = arith.addf %176, %181 : vector<6x256xf32>
    %c0_41 = arith.constant 0 : index
    %c24 = arith.constant 24 : index
    %183 = vector.load %arg2[%c0_41, %c24] : memref<6x36xf32, #tpu.memory_space<vmem>>, vector<6x1xf32>
    %184 = vector.extract_strided_slice %170 {offsets = [2, 0], sizes = [1, 256], strides = [1, 1]} : vector<4x256xf32> to vector<1x256xf32>
    %185 = vector.broadcast %183 : vector<6x1xf32> to vector<6x256xf32>
    %186 = vector.broadcast %184 : vector<1x256xf32> to vector<6x256xf32>
    %187 = arith.mulf %185, %186 : vector<6x256xf32>
    %188 = arith.addf %182, %187 : vector<6x256xf32>
    %c0_42 = arith.constant 0 : index
    %c33 = arith.constant 33 : index
    %189 = vector.load %arg2[%c0_42, %c33] : memref<6x36xf32, #tpu.memory_space<vmem>>, vector<6x1xf32>
    %190 = vector.extract_strided_slice %170 {offsets = [3, 0], sizes = [1, 256], strides = [1, 1]} : vector<4x256xf32> to vector<1x256xf32>
    %191 = vector.broadcast %189 : vector<6x1xf32> to vector<6x256xf32>
    %192 = vector.broadcast %190 : vector<1x256xf32> to vector<6x256xf32>
    %193 = arith.mulf %191, %192 : vector<6x256xf32>
    %194 = arith.addf %188, %193 : vector<6x256xf32>
    %c240_i32 = arith.constant 240 : i32
    %195 = tpu.dynamic_rotate %1 by %c240_i32 dim 1 : vector<4x256xf32>, i32 -> vector<4x256xf32>
    %c7 = arith.constant 7 : index
    %c0_43 = arith.constant 0 : index
    %196 = vector.load %arg6[%c7, %c0_43] : memref<9x256xf32, #tpu.memory_space<vmem>>, vector<1x256xf32>
    %197 = vector.broadcast %196 : vector<1x256xf32> to vector<4x256xf32>
    %198 = arith.mulf %195, %197 : vector<4x256xf32>
    %c0_44 = arith.constant 0 : index
    %c7_45 = arith.constant 7 : index
    %199 = vector.load %arg2[%c0_44, %c7_45] : memref<6x36xf32, #tpu.memory_space<vmem>>, vector<6x1xf32>
    %200 = vector.extract_strided_slice %198 {offsets = [0, 0], sizes = [1, 256], strides = [1, 1]} : vector<4x256xf32> to vector<1x256xf32>
    %201 = vector.broadcast %199 : vector<6x1xf32> to vector<6x256xf32>
    %202 = vector.broadcast %200 : vector<1x256xf32> to vector<6x256xf32>
    %203 = arith.mulf %201, %202 : vector<6x256xf32>
    %204 = arith.addf %194, %203 : vector<6x256xf32>
    %c0_46 = arith.constant 0 : index
    %c16 = arith.constant 16 : index
    %205 = vector.load %arg2[%c0_46, %c16] : memref<6x36xf32, #tpu.memory_space<vmem>>, vector<6x1xf32>
    %206 = vector.extract_strided_slice %198 {offsets = [1, 0], sizes = [1, 256], strides = [1, 1]} : vector<4x256xf32> to vector<1x256xf32>
    %207 = vector.broadcast %205 : vector<6x1xf32> to vector<6x256xf32>
    %208 = vector.broadcast %206 : vector<1x256xf32> to vector<6x256xf32>
    %209 = arith.mulf %207, %208 : vector<6x256xf32>
    %210 = arith.addf %204, %209 : vector<6x256xf32>
    %c0_47 = arith.constant 0 : index
    %c25 = arith.constant 25 : index
    %211 = vector.load %arg2[%c0_47, %c25] : memref<6x36xf32, #tpu.memory_space<vmem>>, vector<6x1xf32>
    %212 = vector.extract_strided_slice %198 {offsets = [2, 0], sizes = [1, 256], strides = [1, 1]} : vector<4x256xf32> to vector<1x256xf32>
    %213 = vector.broadcast %211 : vector<6x1xf32> to vector<6x256xf32>
    %214 = vector.broadcast %212 : vector<1x256xf32> to vector<6x256xf32>
    %215 = arith.mulf %213, %214 : vector<6x256xf32>
    %216 = arith.addf %210, %215 : vector<6x256xf32>
    %c0_48 = arith.constant 0 : index
    %c34 = arith.constant 34 : index
    %217 = vector.load %arg2[%c0_48, %c34] : memref<6x36xf32, #tpu.memory_space<vmem>>, vector<6x1xf32>
    %218 = vector.extract_strided_slice %198 {offsets = [3, 0], sizes = [1, 256], strides = [1, 1]} : vector<4x256xf32> to vector<1x256xf32>
    %219 = vector.broadcast %217 : vector<6x1xf32> to vector<6x256xf32>
    %220 = vector.broadcast %218 : vector<1x256xf32> to vector<6x256xf32>
    %221 = arith.mulf %219, %220 : vector<6x256xf32>
    %222 = arith.addf %216, %221 : vector<6x256xf32>
    %c239_i32 = arith.constant 239 : i32
    %223 = tpu.dynamic_rotate %1 by %c239_i32 dim 1 : vector<4x256xf32>, i32 -> vector<4x256xf32>
    %c8 = arith.constant 8 : index
    %c0_49 = arith.constant 0 : index
    %224 = vector.load %arg6[%c8, %c0_49] : memref<9x256xf32, #tpu.memory_space<vmem>>, vector<1x256xf32>
    %225 = vector.broadcast %224 : vector<1x256xf32> to vector<4x256xf32>
    %226 = arith.mulf %223, %225 : vector<4x256xf32>
    %c0_50 = arith.constant 0 : index
    %c8_51 = arith.constant 8 : index
    %227 = vector.load %arg2[%c0_50, %c8_51] : memref<6x36xf32, #tpu.memory_space<vmem>>, vector<6x1xf32>
    %228 = vector.extract_strided_slice %226 {offsets = [0, 0], sizes = [1, 256], strides = [1, 1]} : vector<4x256xf32> to vector<1x256xf32>
    %229 = vector.broadcast %227 : vector<6x1xf32> to vector<6x256xf32>
    %230 = vector.broadcast %228 : vector<1x256xf32> to vector<6x256xf32>
    %231 = arith.mulf %229, %230 : vector<6x256xf32>
    %232 = arith.addf %222, %231 : vector<6x256xf32>
    %c0_52 = arith.constant 0 : index
    %c17 = arith.constant 17 : index
    %233 = vector.load %arg2[%c0_52, %c17] : memref<6x36xf32, #tpu.memory_space<vmem>>, vector<6x1xf32>
    %234 = vector.extract_strided_slice %226 {offsets = [1, 0], sizes = [1, 256], strides = [1, 1]} : vector<4x256xf32> to vector<1x256xf32>
    %235 = vector.broadcast %233 : vector<6x1xf32> to vector<6x256xf32>
    %236 = vector.broadcast %234 : vector<1x256xf32> to vector<6x256xf32>
    %237 = arith.mulf %235, %236 : vector<6x256xf32>
    %238 = arith.addf %232, %237 : vector<6x256xf32>
    %c0_53 = arith.constant 0 : index
    %c26 = arith.constant 26 : index
    %239 = vector.load %arg2[%c0_53, %c26] : memref<6x36xf32, #tpu.memory_space<vmem>>, vector<6x1xf32>
    %240 = vector.extract_strided_slice %226 {offsets = [2, 0], sizes = [1, 256], strides = [1, 1]} : vector<4x256xf32> to vector<1x256xf32>
    %241 = vector.broadcast %239 : vector<6x1xf32> to vector<6x256xf32>
    %242 = vector.broadcast %240 : vector<1x256xf32> to vector<6x256xf32>
    %243 = arith.mulf %241, %242 : vector<6x256xf32>
    %244 = arith.addf %238, %243 : vector<6x256xf32>
    %c0_54 = arith.constant 0 : index
    %c35 = arith.constant 35 : index
    %245 = vector.load %arg2[%c0_54, %c35] : memref<6x36xf32, #tpu.memory_space<vmem>>, vector<6x1xf32>
    %246 = vector.extract_strided_slice %226 {offsets = [3, 0], sizes = [1, 256], strides = [1, 1]} : vector<4x256xf32> to vector<1x256xf32>
    %247 = vector.broadcast %245 : vector<6x1xf32> to vector<6x256xf32>
    %248 = vector.broadcast %246 : vector<1x256xf32> to vector<6x256xf32>
    %249 = arith.mulf %247, %248 : vector<6x256xf32>
    %250 = arith.addf %244, %249 : vector<6x256xf32>
    %c0_55 = arith.constant 0 : index
    %c0_56 = arith.constant 0 : index
    %251 = vector.load %arg3[%c0_55, %c0_56] : memref<6x1xf32, #tpu.memory_space<vmem>>, vector<6x1xf32>
    %252 = vector.broadcast %251 : vector<6x1xf32> to vector<6x256xf32>
    %253 = arith.addf %250, %252 : vector<6x256xf32>
    %cst_57 = arith.constant 0.000000e+00 : f32
    %254 = vector.broadcast %cst_57 : f32 to vector<6x256xf32>
    %255 = arith.maximumf %253, %254 : vector<6x256xf32>
    %cst_58 = arith.constant 0.000000e+00 : f32
    %256 = vector.broadcast %cst_58 : f32 to vector<6x256xf32>
    %c17_i32_59 = arith.constant 17 : i32
    %257 = tpu.dynamic_rotate %255 by %c17_i32_59 dim 1 : vector<6x256xf32>, i32 -> vector<6x256xf32>
    %c0_60 = arith.constant 0 : index
    %c0_61 = arith.constant 0 : index
    %258 = vector.load %arg6[%c0_60, %c0_61] : memref<9x256xf32, #tpu.memory_space<vmem>>, vector<1x256xf32>
    %259 = vector.broadcast %258 : vector<1x256xf32> to vector<6x256xf32>
    %260 = arith.mulf %257, %259 : vector<6x256xf32>
    %c0_62 = arith.constant 0 : index
    %c0_63 = arith.constant 0 : index
    %261 = vector.load %arg4[%c0_62, %c0_63] : memref<6x54xf32, #tpu.memory_space<vmem>>, vector<6x1xf32>
    %262 = vector.extract_strided_slice %260 {offsets = [0, 0], sizes = [1, 256], strides = [1, 1]} : vector<6x256xf32> to vector<1x256xf32>
    %263 = vector.broadcast %261 : vector<6x1xf32> to vector<6x256xf32>
    %264 = vector.broadcast %262 : vector<1x256xf32> to vector<6x256xf32>
    %265 = arith.mulf %263, %264 : vector<6x256xf32>
    %266 = arith.addf %256, %265 : vector<6x256xf32>
    %c0_64 = arith.constant 0 : index
    %c9_65 = arith.constant 9 : index
    %267 = vector.load %arg4[%c0_64, %c9_65] : memref<6x54xf32, #tpu.memory_space<vmem>>, vector<6x1xf32>
    %268 = vector.extract_strided_slice %260 {offsets = [1, 0], sizes = [1, 256], strides = [1, 1]} : vector<6x256xf32> to vector<1x256xf32>
    %269 = vector.broadcast %267 : vector<6x1xf32> to vector<6x256xf32>
    %270 = vector.broadcast %268 : vector<1x256xf32> to vector<6x256xf32>
    %271 = arith.mulf %269, %270 : vector<6x256xf32>
    %272 = arith.addf %266, %271 : vector<6x256xf32>
    %c0_66 = arith.constant 0 : index
    %c18_67 = arith.constant 18 : index
    %273 = vector.load %arg4[%c0_66, %c18_67] : memref<6x54xf32, #tpu.memory_space<vmem>>, vector<6x1xf32>
    %274 = vector.extract_strided_slice %260 {offsets = [2, 0], sizes = [1, 256], strides = [1, 1]} : vector<6x256xf32> to vector<1x256xf32>
    %275 = vector.broadcast %273 : vector<6x1xf32> to vector<6x256xf32>
    %276 = vector.broadcast %274 : vector<1x256xf32> to vector<6x256xf32>
    %277 = arith.mulf %275, %276 : vector<6x256xf32>
    %278 = arith.addf %272, %277 : vector<6x256xf32>
    %c0_68 = arith.constant 0 : index
    %c27_69 = arith.constant 27 : index
    %279 = vector.load %arg4[%c0_68, %c27_69] : memref<6x54xf32, #tpu.memory_space<vmem>>, vector<6x1xf32>
    %280 = vector.extract_strided_slice %260 {offsets = [3, 0], sizes = [1, 256], strides = [1, 1]} : vector<6x256xf32> to vector<1x256xf32>
    %281 = vector.broadcast %279 : vector<6x1xf32> to vector<6x256xf32>
    %282 = vector.broadcast %280 : vector<1x256xf32> to vector<6x256xf32>
    %283 = arith.mulf %281, %282 : vector<6x256xf32>
    %284 = arith.addf %278, %283 : vector<6x256xf32>
    %c0_70 = arith.constant 0 : index
    %c36 = arith.constant 36 : index
    %285 = vector.load %arg4[%c0_70, %c36] : memref<6x54xf32, #tpu.memory_space<vmem>>, vector<6x1xf32>
    %286 = vector.extract_strided_slice %260 {offsets = [4, 0], sizes = [1, 256], strides = [1, 1]} : vector<6x256xf32> to vector<1x256xf32>
    %287 = vector.broadcast %285 : vector<6x1xf32> to vector<6x256xf32>
    %288 = vector.broadcast %286 : vector<1x256xf32> to vector<6x256xf32>
    %289 = arith.mulf %287, %288 : vector<6x256xf32>
    %290 = arith.addf %284, %289 : vector<6x256xf32>
    %c0_71 = arith.constant 0 : index
    %c45 = arith.constant 45 : index
    %291 = vector.load %arg4[%c0_71, %c45] : memref<6x54xf32, #tpu.memory_space<vmem>>, vector<6x1xf32>
    %292 = vector.extract_strided_slice %260 {offsets = [5, 0], sizes = [1, 256], strides = [1, 1]} : vector<6x256xf32> to vector<1x256xf32>
    %293 = vector.broadcast %291 : vector<6x1xf32> to vector<6x256xf32>
    %294 = vector.broadcast %292 : vector<1x256xf32> to vector<6x256xf32>
    %295 = arith.mulf %293, %294 : vector<6x256xf32>
    %296 = arith.addf %290, %295 : vector<6x256xf32>
    %c16_i32_72 = arith.constant 16 : i32
    %297 = tpu.dynamic_rotate %255 by %c16_i32_72 dim 1 : vector<6x256xf32>, i32 -> vector<6x256xf32>
    %c1_73 = arith.constant 1 : index
    %c0_74 = arith.constant 0 : index
    %298 = vector.load %arg6[%c1_73, %c0_74] : memref<9x256xf32, #tpu.memory_space<vmem>>, vector<1x256xf32>
    %299 = vector.broadcast %298 : vector<1x256xf32> to vector<6x256xf32>
    %300 = arith.mulf %297, %299 : vector<6x256xf32>
    %c0_75 = arith.constant 0 : index
    %c1_76 = arith.constant 1 : index
    %301 = vector.load %arg4[%c0_75, %c1_76] : memref<6x54xf32, #tpu.memory_space<vmem>>, vector<6x1xf32>
    %302 = vector.extract_strided_slice %300 {offsets = [0, 0], sizes = [1, 256], strides = [1, 1]} : vector<6x256xf32> to vector<1x256xf32>
    %303 = vector.broadcast %301 : vector<6x1xf32> to vector<6x256xf32>
    %304 = vector.broadcast %302 : vector<1x256xf32> to vector<6x256xf32>
    %305 = arith.mulf %303, %304 : vector<6x256xf32>
    %306 = arith.addf %296, %305 : vector<6x256xf32>
    %c0_77 = arith.constant 0 : index
    %c10_78 = arith.constant 10 : index
    %307 = vector.load %arg4[%c0_77, %c10_78] : memref<6x54xf32, #tpu.memory_space<vmem>>, vector<6x1xf32>
    %308 = vector.extract_strided_slice %300 {offsets = [1, 0], sizes = [1, 256], strides = [1, 1]} : vector<6x256xf32> to vector<1x256xf32>
    %309 = vector.broadcast %307 : vector<6x1xf32> to vector<6x256xf32>
    %310 = vector.broadcast %308 : vector<1x256xf32> to vector<6x256xf32>
    %311 = arith.mulf %309, %310 : vector<6x256xf32>
    %312 = arith.addf %306, %311 : vector<6x256xf32>
    %c0_79 = arith.constant 0 : index
    %c19_80 = arith.constant 19 : index
    %313 = vector.load %arg4[%c0_79, %c19_80] : memref<6x54xf32, #tpu.memory_space<vmem>>, vector<6x1xf32>
    %314 = vector.extract_strided_slice %300 {offsets = [2, 0], sizes = [1, 256], strides = [1, 1]} : vector<6x256xf32> to vector<1x256xf32>
    %315 = vector.broadcast %313 : vector<6x1xf32> to vector<6x256xf32>
    %316 = vector.broadcast %314 : vector<1x256xf32> to vector<6x256xf32>
    %317 = arith.mulf %315, %316 : vector<6x256xf32>
    %318 = arith.addf %312, %317 : vector<6x256xf32>
    %c0_81 = arith.constant 0 : index
    %c28_82 = arith.constant 28 : index
    %319 = vector.load %arg4[%c0_81, %c28_82] : memref<6x54xf32, #tpu.memory_space<vmem>>, vector<6x1xf32>
    %320 = vector.extract_strided_slice %300 {offsets = [3, 0], sizes = [1, 256], strides = [1, 1]} : vector<6x256xf32> to vector<1x256xf32>
    %321 = vector.broadcast %319 : vector<6x1xf32> to vector<6x256xf32>
    %322 = vector.broadcast %320 : vector<1x256xf32> to vector<6x256xf32>
    %323 = arith.mulf %321, %322 : vector<6x256xf32>
    %324 = arith.addf %318, %323 : vector<6x256xf32>
    %c0_83 = arith.constant 0 : index
    %c37 = arith.constant 37 : index
    %325 = vector.load %arg4[%c0_83, %c37] : memref<6x54xf32, #tpu.memory_space<vmem>>, vector<6x1xf32>
    %326 = vector.extract_strided_slice %300 {offsets = [4, 0], sizes = [1, 256], strides = [1, 1]} : vector<6x256xf32> to vector<1x256xf32>
    %327 = vector.broadcast %325 : vector<6x1xf32> to vector<6x256xf32>
    %328 = vector.broadcast %326 : vector<1x256xf32> to vector<6x256xf32>
    %329 = arith.mulf %327, %328 : vector<6x256xf32>
    %330 = arith.addf %324, %329 : vector<6x256xf32>
    %c0_84 = arith.constant 0 : index
    %c46 = arith.constant 46 : index
    %331 = vector.load %arg4[%c0_84, %c46] : memref<6x54xf32, #tpu.memory_space<vmem>>, vector<6x1xf32>
    %332 = vector.extract_strided_slice %300 {offsets = [5, 0], sizes = [1, 256], strides = [1, 1]} : vector<6x256xf32> to vector<1x256xf32>
    %333 = vector.broadcast %331 : vector<6x1xf32> to vector<6x256xf32>
    %334 = vector.broadcast %332 : vector<1x256xf32> to vector<6x256xf32>
    %335 = arith.mulf %333, %334 : vector<6x256xf32>
    %336 = arith.addf %330, %335 : vector<6x256xf32>
    %c15_i32_85 = arith.constant 15 : i32
    %337 = tpu.dynamic_rotate %255 by %c15_i32_85 dim 1 : vector<6x256xf32>, i32 -> vector<6x256xf32>
    %c2_86 = arith.constant 2 : index
    %c0_87 = arith.constant 0 : index
    %338 = vector.load %arg6[%c2_86, %c0_87] : memref<9x256xf32, #tpu.memory_space<vmem>>, vector<1x256xf32>
    %339 = vector.broadcast %338 : vector<1x256xf32> to vector<6x256xf32>
    %340 = arith.mulf %337, %339 : vector<6x256xf32>
    %c0_88 = arith.constant 0 : index
    %c2_89 = arith.constant 2 : index
    %341 = vector.load %arg4[%c0_88, %c2_89] : memref<6x54xf32, #tpu.memory_space<vmem>>, vector<6x1xf32>
    %342 = vector.extract_strided_slice %340 {offsets = [0, 0], sizes = [1, 256], strides = [1, 1]} : vector<6x256xf32> to vector<1x256xf32>
    %343 = vector.broadcast %341 : vector<6x1xf32> to vector<6x256xf32>
    %344 = vector.broadcast %342 : vector<1x256xf32> to vector<6x256xf32>
    %345 = arith.mulf %343, %344 : vector<6x256xf32>
    %346 = arith.addf %336, %345 : vector<6x256xf32>
    %c0_90 = arith.constant 0 : index
    %c11_91 = arith.constant 11 : index
    %347 = vector.load %arg4[%c0_90, %c11_91] : memref<6x54xf32, #tpu.memory_space<vmem>>, vector<6x1xf32>
    %348 = vector.extract_strided_slice %340 {offsets = [1, 0], sizes = [1, 256], strides = [1, 1]} : vector<6x256xf32> to vector<1x256xf32>
    %349 = vector.broadcast %347 : vector<6x1xf32> to vector<6x256xf32>
    %350 = vector.broadcast %348 : vector<1x256xf32> to vector<6x256xf32>
    %351 = arith.mulf %349, %350 : vector<6x256xf32>
    %352 = arith.addf %346, %351 : vector<6x256xf32>
    %c0_92 = arith.constant 0 : index
    %c20_93 = arith.constant 20 : index
    %353 = vector.load %arg4[%c0_92, %c20_93] : memref<6x54xf32, #tpu.memory_space<vmem>>, vector<6x1xf32>
    %354 = vector.extract_strided_slice %340 {offsets = [2, 0], sizes = [1, 256], strides = [1, 1]} : vector<6x256xf32> to vector<1x256xf32>
    %355 = vector.broadcast %353 : vector<6x1xf32> to vector<6x256xf32>
    %356 = vector.broadcast %354 : vector<1x256xf32> to vector<6x256xf32>
    %357 = arith.mulf %355, %356 : vector<6x256xf32>
    %358 = arith.addf %352, %357 : vector<6x256xf32>
    %c0_94 = arith.constant 0 : index
    %c29_95 = arith.constant 29 : index
    %359 = vector.load %arg4[%c0_94, %c29_95] : memref<6x54xf32, #tpu.memory_space<vmem>>, vector<6x1xf32>
    %360 = vector.extract_strided_slice %340 {offsets = [3, 0], sizes = [1, 256], strides = [1, 1]} : vector<6x256xf32> to vector<1x256xf32>
    %361 = vector.broadcast %359 : vector<6x1xf32> to vector<6x256xf32>
    %362 = vector.broadcast %360 : vector<1x256xf32> to vector<6x256xf32>
    %363 = arith.mulf %361, %362 : vector<6x256xf32>
    %364 = arith.addf %358, %363 : vector<6x256xf32>
    %c0_96 = arith.constant 0 : index
    %c38 = arith.constant 38 : index
    %365 = vector.load %arg4[%c0_96, %c38] : memref<6x54xf32, #tpu.memory_space<vmem>>, vector<6x1xf32>
    %366 = vector.extract_strided_slice %340 {offsets = [4, 0], sizes = [1, 256], strides = [1, 1]} : vector<6x256xf32> to vector<1x256xf32>
    %367 = vector.broadcast %365 : vector<6x1xf32> to vector<6x256xf32>
    %368 = vector.broadcast %366 : vector<1x256xf32> to vector<6x256xf32>
    %369 = arith.mulf %367, %368 : vector<6x256xf32>
    %370 = arith.addf %364, %369 : vector<6x256xf32>
    %c0_97 = arith.constant 0 : index
    %c47 = arith.constant 47 : index
    %371 = vector.load %arg4[%c0_97, %c47] : memref<6x54xf32, #tpu.memory_space<vmem>>, vector<6x1xf32>
    %372 = vector.extract_strided_slice %340 {offsets = [5, 0], sizes = [1, 256], strides = [1, 1]} : vector<6x256xf32> to vector<1x256xf32>
    %373 = vector.broadcast %371 : vector<6x1xf32> to vector<6x256xf32>
    %374 = vector.broadcast %372 : vector<1x256xf32> to vector<6x256xf32>
    %375 = arith.mulf %373, %374 : vector<6x256xf32>
    %376 = arith.addf %370, %375 : vector<6x256xf32>
    %c1_i32_98 = arith.constant 1 : i32
    %377 = tpu.dynamic_rotate %255 by %c1_i32_98 dim 1 : vector<6x256xf32>, i32 -> vector<6x256xf32>
    %c3_99 = arith.constant 3 : index
    %c0_100 = arith.constant 0 : index
    %378 = vector.load %arg6[%c3_99, %c0_100] : memref<9x256xf32, #tpu.memory_space<vmem>>, vector<1x256xf32>
    %379 = vector.broadcast %378 : vector<1x256xf32> to vector<6x256xf32>
    %380 = arith.mulf %377, %379 : vector<6x256xf32>
    %c0_101 = arith.constant 0 : index
    %c3_102 = arith.constant 3 : index
    %381 = vector.load %arg4[%c0_101, %c3_102] : memref<6x54xf32, #tpu.memory_space<vmem>>, vector<6x1xf32>
    %382 = vector.extract_strided_slice %380 {offsets = [0, 0], sizes = [1, 256], strides = [1, 1]} : vector<6x256xf32> to vector<1x256xf32>
    %383 = vector.broadcast %381 : vector<6x1xf32> to vector<6x256xf32>
    %384 = vector.broadcast %382 : vector<1x256xf32> to vector<6x256xf32>
    %385 = arith.mulf %383, %384 : vector<6x256xf32>
    %386 = arith.addf %376, %385 : vector<6x256xf32>
    %c0_103 = arith.constant 0 : index
    %c12_104 = arith.constant 12 : index
    %387 = vector.load %arg4[%c0_103, %c12_104] : memref<6x54xf32, #tpu.memory_space<vmem>>, vector<6x1xf32>
    %388 = vector.extract_strided_slice %380 {offsets = [1, 0], sizes = [1, 256], strides = [1, 1]} : vector<6x256xf32> to vector<1x256xf32>
    %389 = vector.broadcast %387 : vector<6x1xf32> to vector<6x256xf32>
    %390 = vector.broadcast %388 : vector<1x256xf32> to vector<6x256xf32>
    %391 = arith.mulf %389, %390 : vector<6x256xf32>
    %392 = arith.addf %386, %391 : vector<6x256xf32>
    %c0_105 = arith.constant 0 : index
    %c21_106 = arith.constant 21 : index
    %393 = vector.load %arg4[%c0_105, %c21_106] : memref<6x54xf32, #tpu.memory_space<vmem>>, vector<6x1xf32>
    %394 = vector.extract_strided_slice %380 {offsets = [2, 0], sizes = [1, 256], strides = [1, 1]} : vector<6x256xf32> to vector<1x256xf32>
    %395 = vector.broadcast %393 : vector<6x1xf32> to vector<6x256xf32>
    %396 = vector.broadcast %394 : vector<1x256xf32> to vector<6x256xf32>
    %397 = arith.mulf %395, %396 : vector<6x256xf32>
    %398 = arith.addf %392, %397 : vector<6x256xf32>
    %c0_107 = arith.constant 0 : index
    %c30_108 = arith.constant 30 : index
    %399 = vector.load %arg4[%c0_107, %c30_108] : memref<6x54xf32, #tpu.memory_space<vmem>>, vector<6x1xf32>
    %400 = vector.extract_strided_slice %380 {offsets = [3, 0], sizes = [1, 256], strides = [1, 1]} : vector<6x256xf32> to vector<1x256xf32>
    %401 = vector.broadcast %399 : vector<6x1xf32> to vector<6x256xf32>
    %402 = vector.broadcast %400 : vector<1x256xf32> to vector<6x256xf32>
    %403 = arith.mulf %401, %402 : vector<6x256xf32>
    %404 = arith.addf %398, %403 : vector<6x256xf32>
    %c0_109 = arith.constant 0 : index
    %c39 = arith.constant 39 : index
    %405 = vector.load %arg4[%c0_109, %c39] : memref<6x54xf32, #tpu.memory_space<vmem>>, vector<6x1xf32>
    %406 = vector.extract_strided_slice %380 {offsets = [4, 0], sizes = [1, 256], strides = [1, 1]} : vector<6x256xf32> to vector<1x256xf32>
    %407 = vector.broadcast %405 : vector<6x1xf32> to vector<6x256xf32>
    %408 = vector.broadcast %406 : vector<1x256xf32> to vector<6x256xf32>
    %409 = arith.mulf %407, %408 : vector<6x256xf32>
    %410 = arith.addf %404, %409 : vector<6x256xf32>
    %c0_110 = arith.constant 0 : index
    %c48 = arith.constant 48 : index
    %411 = vector.load %arg4[%c0_110, %c48] : memref<6x54xf32, #tpu.memory_space<vmem>>, vector<6x1xf32>
    %412 = vector.extract_strided_slice %380 {offsets = [5, 0], sizes = [1, 256], strides = [1, 1]} : vector<6x256xf32> to vector<1x256xf32>
    %413 = vector.broadcast %411 : vector<6x1xf32> to vector<6x256xf32>
    %414 = vector.broadcast %412 : vector<1x256xf32> to vector<6x256xf32>
    %415 = arith.mulf %413, %414 : vector<6x256xf32>
    %416 = arith.addf %410, %415 : vector<6x256xf32>
    %c0_111 = arith.constant 0 : index
    %c4_112 = arith.constant 4 : index
    %417 = vector.load %arg4[%c0_111, %c4_112] : memref<6x54xf32, #tpu.memory_space<vmem>>, vector<6x1xf32>
    %418 = vector.extract_strided_slice %255 {offsets = [0, 0], sizes = [1, 256], strides = [1, 1]} : vector<6x256xf32> to vector<1x256xf32>
    %419 = vector.broadcast %417 : vector<6x1xf32> to vector<6x256xf32>
    %420 = vector.broadcast %418 : vector<1x256xf32> to vector<6x256xf32>
    %421 = arith.mulf %419, %420 : vector<6x256xf32>
    %422 = arith.addf %416, %421 : vector<6x256xf32>
    %c0_113 = arith.constant 0 : index
    %c13_114 = arith.constant 13 : index
    %423 = vector.load %arg4[%c0_113, %c13_114] : memref<6x54xf32, #tpu.memory_space<vmem>>, vector<6x1xf32>
    %424 = vector.extract_strided_slice %255 {offsets = [1, 0], sizes = [1, 256], strides = [1, 1]} : vector<6x256xf32> to vector<1x256xf32>
    %425 = vector.broadcast %423 : vector<6x1xf32> to vector<6x256xf32>
    %426 = vector.broadcast %424 : vector<1x256xf32> to vector<6x256xf32>
    %427 = arith.mulf %425, %426 : vector<6x256xf32>
    %428 = arith.addf %422, %427 : vector<6x256xf32>
    %c0_115 = arith.constant 0 : index
    %c22_116 = arith.constant 22 : index
    %429 = vector.load %arg4[%c0_115, %c22_116] : memref<6x54xf32, #tpu.memory_space<vmem>>, vector<6x1xf32>
    %430 = vector.extract_strided_slice %255 {offsets = [2, 0], sizes = [1, 256], strides = [1, 1]} : vector<6x256xf32> to vector<1x256xf32>
    %431 = vector.broadcast %429 : vector<6x1xf32> to vector<6x256xf32>
    %432 = vector.broadcast %430 : vector<1x256xf32> to vector<6x256xf32>
    %433 = arith.mulf %431, %432 : vector<6x256xf32>
    %434 = arith.addf %428, %433 : vector<6x256xf32>
    %c0_117 = arith.constant 0 : index
    %c31_118 = arith.constant 31 : index
    %435 = vector.load %arg4[%c0_117, %c31_118] : memref<6x54xf32, #tpu.memory_space<vmem>>, vector<6x1xf32>
    %436 = vector.extract_strided_slice %255 {offsets = [3, 0], sizes = [1, 256], strides = [1, 1]} : vector<6x256xf32> to vector<1x256xf32>
    %437 = vector.broadcast %435 : vector<6x1xf32> to vector<6x256xf32>
    %438 = vector.broadcast %436 : vector<1x256xf32> to vector<6x256xf32>
    %439 = arith.mulf %437, %438 : vector<6x256xf32>
    %440 = arith.addf %434, %439 : vector<6x256xf32>
    %c0_119 = arith.constant 0 : index
    %c40 = arith.constant 40 : index
    %441 = vector.load %arg4[%c0_119, %c40] : memref<6x54xf32, #tpu.memory_space<vmem>>, vector<6x1xf32>
    %442 = vector.extract_strided_slice %255 {offsets = [4, 0], sizes = [1, 256], strides = [1, 1]} : vector<6x256xf32> to vector<1x256xf32>
    %443 = vector.broadcast %441 : vector<6x1xf32> to vector<6x256xf32>
    %444 = vector.broadcast %442 : vector<1x256xf32> to vector<6x256xf32>
    %445 = arith.mulf %443, %444 : vector<6x256xf32>
    %446 = arith.addf %440, %445 : vector<6x256xf32>
    %c0_120 = arith.constant 0 : index
    %c49 = arith.constant 49 : index
    %447 = vector.load %arg4[%c0_120, %c49] : memref<6x54xf32, #tpu.memory_space<vmem>>, vector<6x1xf32>
    %448 = vector.extract_strided_slice %255 {offsets = [5, 0], sizes = [1, 256], strides = [1, 1]} : vector<6x256xf32> to vector<1x256xf32>
    %449 = vector.broadcast %447 : vector<6x1xf32> to vector<6x256xf32>
    %450 = vector.broadcast %448 : vector<1x256xf32> to vector<6x256xf32>
    %451 = arith.mulf %449, %450 : vector<6x256xf32>
    %452 = arith.addf %446, %451 : vector<6x256xf32>
    %c255_i32_121 = arith.constant 255 : i32
    %453 = tpu.dynamic_rotate %255 by %c255_i32_121 dim 1 : vector<6x256xf32>, i32 -> vector<6x256xf32>
    %c5_122 = arith.constant 5 : index
    %c0_123 = arith.constant 0 : index
    %454 = vector.load %arg6[%c5_122, %c0_123] : memref<9x256xf32, #tpu.memory_space<vmem>>, vector<1x256xf32>
    %455 = vector.broadcast %454 : vector<1x256xf32> to vector<6x256xf32>
    %456 = arith.mulf %453, %455 : vector<6x256xf32>
    %c0_124 = arith.constant 0 : index
    %c5_125 = arith.constant 5 : index
    %457 = vector.load %arg4[%c0_124, %c5_125] : memref<6x54xf32, #tpu.memory_space<vmem>>, vector<6x1xf32>
    %458 = vector.extract_strided_slice %456 {offsets = [0, 0], sizes = [1, 256], strides = [1, 1]} : vector<6x256xf32> to vector<1x256xf32>
    %459 = vector.broadcast %457 : vector<6x1xf32> to vector<6x256xf32>
    %460 = vector.broadcast %458 : vector<1x256xf32> to vector<6x256xf32>
    %461 = arith.mulf %459, %460 : vector<6x256xf32>
    %462 = arith.addf %452, %461 : vector<6x256xf32>
    %c0_126 = arith.constant 0 : index
    %c14_127 = arith.constant 14 : index
    %463 = vector.load %arg4[%c0_126, %c14_127] : memref<6x54xf32, #tpu.memory_space<vmem>>, vector<6x1xf32>
    %464 = vector.extract_strided_slice %456 {offsets = [1, 0], sizes = [1, 256], strides = [1, 1]} : vector<6x256xf32> to vector<1x256xf32>
    %465 = vector.broadcast %463 : vector<6x1xf32> to vector<6x256xf32>
    %466 = vector.broadcast %464 : vector<1x256xf32> to vector<6x256xf32>
    %467 = arith.mulf %465, %466 : vector<6x256xf32>
    %468 = arith.addf %462, %467 : vector<6x256xf32>
    %c0_128 = arith.constant 0 : index
    %c23_129 = arith.constant 23 : index
    %469 = vector.load %arg4[%c0_128, %c23_129] : memref<6x54xf32, #tpu.memory_space<vmem>>, vector<6x1xf32>
    %470 = vector.extract_strided_slice %456 {offsets = [2, 0], sizes = [1, 256], strides = [1, 1]} : vector<6x256xf32> to vector<1x256xf32>
    %471 = vector.broadcast %469 : vector<6x1xf32> to vector<6x256xf32>
    %472 = vector.broadcast %470 : vector<1x256xf32> to vector<6x256xf32>
    %473 = arith.mulf %471, %472 : vector<6x256xf32>
    %474 = arith.addf %468, %473 : vector<6x256xf32>
    %c0_130 = arith.constant 0 : index
    %c32_131 = arith.constant 32 : index
    %475 = vector.load %arg4[%c0_130, %c32_131] : memref<6x54xf32, #tpu.memory_space<vmem>>, vector<6x1xf32>
    %476 = vector.extract_strided_slice %456 {offsets = [3, 0], sizes = [1, 256], strides = [1, 1]} : vector<6x256xf32> to vector<1x256xf32>
    %477 = vector.broadcast %475 : vector<6x1xf32> to vector<6x256xf32>
    %478 = vector.broadcast %476 : vector<1x256xf32> to vector<6x256xf32>
    %479 = arith.mulf %477, %478 : vector<6x256xf32>
    %480 = arith.addf %474, %479 : vector<6x256xf32>
    %c0_132 = arith.constant 0 : index
    %c41 = arith.constant 41 : index
    %481 = vector.load %arg4[%c0_132, %c41] : memref<6x54xf32, #tpu.memory_space<vmem>>, vector<6x1xf32>
    %482 = vector.extract_strided_slice %456 {offsets = [4, 0], sizes = [1, 256], strides = [1, 1]} : vector<6x256xf32> to vector<1x256xf32>
    %483 = vector.broadcast %481 : vector<6x1xf32> to vector<6x256xf32>
    %484 = vector.broadcast %482 : vector<1x256xf32> to vector<6x256xf32>
    %485 = arith.mulf %483, %484 : vector<6x256xf32>
    %486 = arith.addf %480, %485 : vector<6x256xf32>
    %c0_133 = arith.constant 0 : index
    %c50 = arith.constant 50 : index
    %487 = vector.load %arg4[%c0_133, %c50] : memref<6x54xf32, #tpu.memory_space<vmem>>, vector<6x1xf32>
    %488 = vector.extract_strided_slice %456 {offsets = [5, 0], sizes = [1, 256], strides = [1, 1]} : vector<6x256xf32> to vector<1x256xf32>
    %489 = vector.broadcast %487 : vector<6x1xf32> to vector<6x256xf32>
    %490 = vector.broadcast %488 : vector<1x256xf32> to vector<6x256xf32>
    %491 = arith.mulf %489, %490 : vector<6x256xf32>
    %492 = arith.addf %486, %491 : vector<6x256xf32>
    %c241_i32_134 = arith.constant 241 : i32
    %493 = tpu.dynamic_rotate %255 by %c241_i32_134 dim 1 : vector<6x256xf32>, i32 -> vector<6x256xf32>
    %c6_135 = arith.constant 6 : index
    %c0_136 = arith.constant 0 : index
    %494 = vector.load %arg6[%c6_135, %c0_136] : memref<9x256xf32, #tpu.memory_space<vmem>>, vector<1x256xf32>
    %495 = vector.broadcast %494 : vector<1x256xf32> to vector<6x256xf32>
    %496 = arith.mulf %493, %495 : vector<6x256xf32>
    %c0_137 = arith.constant 0 : index
    %c6_138 = arith.constant 6 : index
    %497 = vector.load %arg4[%c0_137, %c6_138] : memref<6x54xf32, #tpu.memory_space<vmem>>, vector<6x1xf32>
    %498 = vector.extract_strided_slice %496 {offsets = [0, 0], sizes = [1, 256], strides = [1, 1]} : vector<6x256xf32> to vector<1x256xf32>
    %499 = vector.broadcast %497 : vector<6x1xf32> to vector<6x256xf32>
    %500 = vector.broadcast %498 : vector<1x256xf32> to vector<6x256xf32>
    %501 = arith.mulf %499, %500 : vector<6x256xf32>
    %502 = arith.addf %492, %501 : vector<6x256xf32>
    %c0_139 = arith.constant 0 : index
    %c15_140 = arith.constant 15 : index
    %503 = vector.load %arg4[%c0_139, %c15_140] : memref<6x54xf32, #tpu.memory_space<vmem>>, vector<6x1xf32>
    %504 = vector.extract_strided_slice %496 {offsets = [1, 0], sizes = [1, 256], strides = [1, 1]} : vector<6x256xf32> to vector<1x256xf32>
    %505 = vector.broadcast %503 : vector<6x1xf32> to vector<6x256xf32>
    %506 = vector.broadcast %504 : vector<1x256xf32> to vector<6x256xf32>
    %507 = arith.mulf %505, %506 : vector<6x256xf32>
    %508 = arith.addf %502, %507 : vector<6x256xf32>
    %c0_141 = arith.constant 0 : index
    %c24_142 = arith.constant 24 : index
    %509 = vector.load %arg4[%c0_141, %c24_142] : memref<6x54xf32, #tpu.memory_space<vmem>>, vector<6x1xf32>
    %510 = vector.extract_strided_slice %496 {offsets = [2, 0], sizes = [1, 256], strides = [1, 1]} : vector<6x256xf32> to vector<1x256xf32>
    %511 = vector.broadcast %509 : vector<6x1xf32> to vector<6x256xf32>
    %512 = vector.broadcast %510 : vector<1x256xf32> to vector<6x256xf32>
    %513 = arith.mulf %511, %512 : vector<6x256xf32>
    %514 = arith.addf %508, %513 : vector<6x256xf32>
    %c0_143 = arith.constant 0 : index
    %c33_144 = arith.constant 33 : index
    %515 = vector.load %arg4[%c0_143, %c33_144] : memref<6x54xf32, #tpu.memory_space<vmem>>, vector<6x1xf32>
    %516 = vector.extract_strided_slice %496 {offsets = [3, 0], sizes = [1, 256], strides = [1, 1]} : vector<6x256xf32> to vector<1x256xf32>
    %517 = vector.broadcast %515 : vector<6x1xf32> to vector<6x256xf32>
    %518 = vector.broadcast %516 : vector<1x256xf32> to vector<6x256xf32>
    %519 = arith.mulf %517, %518 : vector<6x256xf32>
    %520 = arith.addf %514, %519 : vector<6x256xf32>
    %c0_145 = arith.constant 0 : index
    %c42 = arith.constant 42 : index
    %521 = vector.load %arg4[%c0_145, %c42] : memref<6x54xf32, #tpu.memory_space<vmem>>, vector<6x1xf32>
    %522 = vector.extract_strided_slice %496 {offsets = [4, 0], sizes = [1, 256], strides = [1, 1]} : vector<6x256xf32> to vector<1x256xf32>
    %523 = vector.broadcast %521 : vector<6x1xf32> to vector<6x256xf32>
    %524 = vector.broadcast %522 : vector<1x256xf32> to vector<6x256xf32>
    %525 = arith.mulf %523, %524 : vector<6x256xf32>
    %526 = arith.addf %520, %525 : vector<6x256xf32>
    %c0_146 = arith.constant 0 : index
    %c51 = arith.constant 51 : index
    %527 = vector.load %arg4[%c0_146, %c51] : memref<6x54xf32, #tpu.memory_space<vmem>>, vector<6x1xf32>
    %528 = vector.extract_strided_slice %496 {offsets = [5, 0], sizes = [1, 256], strides = [1, 1]} : vector<6x256xf32> to vector<1x256xf32>
    %529 = vector.broadcast %527 : vector<6x1xf32> to vector<6x256xf32>
    %530 = vector.broadcast %528 : vector<1x256xf32> to vector<6x256xf32>
    %531 = arith.mulf %529, %530 : vector<6x256xf32>
    %532 = arith.addf %526, %531 : vector<6x256xf32>
    %c240_i32_147 = arith.constant 240 : i32
    %533 = tpu.dynamic_rotate %255 by %c240_i32_147 dim 1 : vector<6x256xf32>, i32 -> vector<6x256xf32>
    %c7_148 = arith.constant 7 : index
    %c0_149 = arith.constant 0 : index
    %534 = vector.load %arg6[%c7_148, %c0_149] : memref<9x256xf32, #tpu.memory_space<vmem>>, vector<1x256xf32>
    %535 = vector.broadcast %534 : vector<1x256xf32> to vector<6x256xf32>
    %536 = arith.mulf %533, %535 : vector<6x256xf32>
    %c0_150 = arith.constant 0 : index
    %c7_151 = arith.constant 7 : index
    %537 = vector.load %arg4[%c0_150, %c7_151] : memref<6x54xf32, #tpu.memory_space<vmem>>, vector<6x1xf32>
    %538 = vector.extract_strided_slice %536 {offsets = [0, 0], sizes = [1, 256], strides = [1, 1]} : vector<6x256xf32> to vector<1x256xf32>
    %539 = vector.broadcast %537 : vector<6x1xf32> to vector<6x256xf32>
    %540 = vector.broadcast %538 : vector<1x256xf32> to vector<6x256xf32>
    %541 = arith.mulf %539, %540 : vector<6x256xf32>
    %542 = arith.addf %532, %541 : vector<6x256xf32>
    %c0_152 = arith.constant 0 : index
    %c16_153 = arith.constant 16 : index
    %543 = vector.load %arg4[%c0_152, %c16_153] : memref<6x54xf32, #tpu.memory_space<vmem>>, vector<6x1xf32>
    %544 = vector.extract_strided_slice %536 {offsets = [1, 0], sizes = [1, 256], strides = [1, 1]} : vector<6x256xf32> to vector<1x256xf32>
    %545 = vector.broadcast %543 : vector<6x1xf32> to vector<6x256xf32>
    %546 = vector.broadcast %544 : vector<1x256xf32> to vector<6x256xf32>
    %547 = arith.mulf %545, %546 : vector<6x256xf32>
    %548 = arith.addf %542, %547 : vector<6x256xf32>
    %c0_154 = arith.constant 0 : index
    %c25_155 = arith.constant 25 : index
    %549 = vector.load %arg4[%c0_154, %c25_155] : memref<6x54xf32, #tpu.memory_space<vmem>>, vector<6x1xf32>
    %550 = vector.extract_strided_slice %536 {offsets = [2, 0], sizes = [1, 256], strides = [1, 1]} : vector<6x256xf32> to vector<1x256xf32>
    %551 = vector.broadcast %549 : vector<6x1xf32> to vector<6x256xf32>
    %552 = vector.broadcast %550 : vector<1x256xf32> to vector<6x256xf32>
    %553 = arith.mulf %551, %552 : vector<6x256xf32>
    %554 = arith.addf %548, %553 : vector<6x256xf32>
    %c0_156 = arith.constant 0 : index
    %c34_157 = arith.constant 34 : index
    %555 = vector.load %arg4[%c0_156, %c34_157] : memref<6x54xf32, #tpu.memory_space<vmem>>, vector<6x1xf32>
    %556 = vector.extract_strided_slice %536 {offsets = [3, 0], sizes = [1, 256], strides = [1, 1]} : vector<6x256xf32> to vector<1x256xf32>
    %557 = vector.broadcast %555 : vector<6x1xf32> to vector<6x256xf32>
    %558 = vector.broadcast %556 : vector<1x256xf32> to vector<6x256xf32>
    %559 = arith.mulf %557, %558 : vector<6x256xf32>
    %560 = arith.addf %554, %559 : vector<6x256xf32>
    %c0_158 = arith.constant 0 : index
    %c43 = arith.constant 43 : index
    %561 = vector.load %arg4[%c0_158, %c43] : memref<6x54xf32, #tpu.memory_space<vmem>>, vector<6x1xf32>
    %562 = vector.extract_strided_slice %536 {offsets = [4, 0], sizes = [1, 256], strides = [1, 1]} : vector<6x256xf32> to vector<1x256xf32>
    %563 = vector.broadcast %561 : vector<6x1xf32> to vector<6x256xf32>
    %564 = vector.broadcast %562 : vector<1x256xf32> to vector<6x256xf32>
    %565 = arith.mulf %563, %564 : vector<6x256xf32>
    %566 = arith.addf %560, %565 : vector<6x256xf32>
    %c0_159 = arith.constant 0 : index
    %c52 = arith.constant 52 : index
    %567 = vector.load %arg4[%c0_159, %c52] : memref<6x54xf32, #tpu.memory_space<vmem>>, vector<6x1xf32>
    %568 = vector.extract_strided_slice %536 {offsets = [5, 0], sizes = [1, 256], strides = [1, 1]} : vector<6x256xf32> to vector<1x256xf32>
    %569 = vector.broadcast %567 : vector<6x1xf32> to vector<6x256xf32>
    %570 = vector.broadcast %568 : vector<1x256xf32> to vector<6x256xf32>
    %571 = arith.mulf %569, %570 : vector<6x256xf32>
    %572 = arith.addf %566, %571 : vector<6x256xf32>
    %c239_i32_160 = arith.constant 239 : i32
    %573 = tpu.dynamic_rotate %255 by %c239_i32_160 dim 1 : vector<6x256xf32>, i32 -> vector<6x256xf32>
    %c8_161 = arith.constant 8 : index
    %c0_162 = arith.constant 0 : index
    %574 = vector.load %arg6[%c8_161, %c0_162] : memref<9x256xf32, #tpu.memory_space<vmem>>, vector<1x256xf32>
    %575 = vector.broadcast %574 : vector<1x256xf32> to vector<6x256xf32>
    %576 = arith.mulf %573, %575 : vector<6x256xf32>
    %c0_163 = arith.constant 0 : index
    %c8_164 = arith.constant 8 : index
    %577 = vector.load %arg4[%c0_163, %c8_164] : memref<6x54xf32, #tpu.memory_space<vmem>>, vector<6x1xf32>
    %578 = vector.extract_strided_slice %576 {offsets = [0, 0], sizes = [1, 256], strides = [1, 1]} : vector<6x256xf32> to vector<1x256xf32>
    %579 = vector.broadcast %577 : vector<6x1xf32> to vector<6x256xf32>
    %580 = vector.broadcast %578 : vector<1x256xf32> to vector<6x256xf32>
    %581 = arith.mulf %579, %580 : vector<6x256xf32>
    %582 = arith.addf %572, %581 : vector<6x256xf32>
    %c0_165 = arith.constant 0 : index
    %c17_166 = arith.constant 17 : index
    %583 = vector.load %arg4[%c0_165, %c17_166] : memref<6x54xf32, #tpu.memory_space<vmem>>, vector<6x1xf32>
    %584 = vector.extract_strided_slice %576 {offsets = [1, 0], sizes = [1, 256], strides = [1, 1]} : vector<6x256xf32> to vector<1x256xf32>
    %585 = vector.broadcast %583 : vector<6x1xf32> to vector<6x256xf32>
    %586 = vector.broadcast %584 : vector<1x256xf32> to vector<6x256xf32>
    %587 = arith.mulf %585, %586 : vector<6x256xf32>
    %588 = arith.addf %582, %587 : vector<6x256xf32>
    %c0_167 = arith.constant 0 : index
    %c26_168 = arith.constant 26 : index
    %589 = vector.load %arg4[%c0_167, %c26_168] : memref<6x54xf32, #tpu.memory_space<vmem>>, vector<6x1xf32>
    %590 = vector.extract_strided_slice %576 {offsets = [2, 0], sizes = [1, 256], strides = [1, 1]} : vector<6x256xf32> to vector<1x256xf32>
    %591 = vector.broadcast %589 : vector<6x1xf32> to vector<6x256xf32>
    %592 = vector.broadcast %590 : vector<1x256xf32> to vector<6x256xf32>
    %593 = arith.mulf %591, %592 : vector<6x256xf32>
    %594 = arith.addf %588, %593 : vector<6x256xf32>
    %c0_169 = arith.constant 0 : index
    %c35_170 = arith.constant 35 : index
    %595 = vector.load %arg4[%c0_169, %c35_170] : memref<6x54xf32, #tpu.memory_space<vmem>>, vector<6x1xf32>
    %596 = vector.extract_strided_slice %576 {offsets = [3, 0], sizes = [1, 256], strides = [1, 1]} : vector<6x256xf32> to vector<1x256xf32>
    %597 = vector.broadcast %595 : vector<6x1xf32> to vector<6x256xf32>
    %598 = vector.broadcast %596 : vector<1x256xf32> to vector<6x256xf32>
    %599 = arith.mulf %597, %598 : vector<6x256xf32>
    %600 = arith.addf %594, %599 : vector<6x256xf32>
    %c0_171 = arith.constant 0 : index
    %c44 = arith.constant 44 : index
    %601 = vector.load %arg4[%c0_171, %c44] : memref<6x54xf32, #tpu.memory_space<vmem>>, vector<6x1xf32>
    %602 = vector.extract_strided_slice %576 {offsets = [4, 0], sizes = [1, 256], strides = [1, 1]} : vector<6x256xf32> to vector<1x256xf32>
    %603 = vector.broadcast %601 : vector<6x1xf32> to vector<6x256xf32>
    %604 = vector.broadcast %602 : vector<1x256xf32> to vector<6x256xf32>
    %605 = arith.mulf %603, %604 : vector<6x256xf32>
    %606 = arith.addf %600, %605 : vector<6x256xf32>
    %c0_172 = arith.constant 0 : index
    %c53 = arith.constant 53 : index
    %607 = vector.load %arg4[%c0_172, %c53] : memref<6x54xf32, #tpu.memory_space<vmem>>, vector<6x1xf32>
    %608 = vector.extract_strided_slice %576 {offsets = [5, 0], sizes = [1, 256], strides = [1, 1]} : vector<6x256xf32> to vector<1x256xf32>
    %609 = vector.broadcast %607 : vector<6x1xf32> to vector<6x256xf32>
    %610 = vector.broadcast %608 : vector<1x256xf32> to vector<6x256xf32>
    %611 = arith.mulf %609, %610 : vector<6x256xf32>
    %612 = arith.addf %606, %611 : vector<6x256xf32>
    %c0_173 = arith.constant 0 : index
    %c0_174 = arith.constant 0 : index
    %613 = vector.load %arg5[%c0_173, %c0_174] : memref<6x1xf32, #tpu.memory_space<vmem>>, vector<6x1xf32>
    %614 = vector.broadcast %613 : vector<6x1xf32> to vector<6x256xf32>
    %615 = arith.addf %612, %614 : vector<6x256xf32>
    %cst_175 = arith.constant 0.000000e+00 : f32
    %616 = vector.broadcast %cst_175 : f32 to vector<6x256xf32>
    %617 = arith.maximumf %615, %616 : vector<6x256xf32>
    %c0_176 = arith.constant 0 : index
    %c0_177 = arith.constant 0 : index
    %c0_178 = arith.constant 0 : index
    %618 = vector.load %arg7[%c0_176, %c0_177, %c0_178] : memref<1x6x256xf32, #tpu.memory_space<vmem>>, vector<1x6x256xf32>
    %619 = vector.shape_cast %618 : vector<1x6x256xf32> to vector<6x256xf32>
    %620 = vector.shape_cast %617 : vector<6x256xf32> to vector<1x6x256xf32>
    tpu.vector_store %arg7[%c0_176, %c0_177, %c0_178], %620 {strides = array<i32>} : memref<1x6x256xf32, #tpu.memory_space<vmem>>, vector<1x6x256xf32>,
    return
  }
  func.func @transform_0(%arg0: i32) -> (i32, i32, i32) {
    %c0_i32 = arith.constant 0 : i32
    %c0_i32_0 = arith.constant 0 : i32
    %c0_i32_1 = arith.constant 0 : i32
    return %arg0, %c0_i32, %c0_i32_0 : i32, i32, i32
  }
  func.func @transform_1(%arg0: i32) -> (i32, i32) {
    %c0_i32 = arith.constant 0 : i32
    %c0_i32_0 = arith.constant 0 : i32
    %c0_i32_1 = arith.constant 0 : i32
    return %c0_i32, %c0_i32_0 : i32, i32
  }
  func.func @transform_2(%arg0: i32) -> (i32, i32) {
    %c0_i32 = arith.constant 0 : i32
    %c0_i32_0 = arith.constant 0 : i32
    %c0_i32_1 = arith.constant 0 : i32
    return %c0_i32, %c0_i32_0 : i32, i32
  }
  func.func @transform_3(%arg0: i32) -> (i32, i32) {
    %c0_i32 = arith.constant 0 : i32
    %c0_i32_0 = arith.constant 0 : i32
    %c0_i32_1 = arith.constant 0 : i32
    return %c0_i32, %c0_i32_0 : i32, i32
  }
  func.func @transform_4(%arg0: i32) -> (i32, i32) {
    %c0_i32 = arith.constant 0 : i32
    %c0_i32_0 = arith.constant 0 : i32
    %c0_i32_1 = arith.constant 0 : i32
    return %c0_i32, %c0_i32_0 : i32, i32
  }
  func.func @transform_5(%arg0: i32) -> (i32, i32) {
    %c0_i32 = arith.constant 0 : i32
    %c0_i32_0 = arith.constant 0 : i32
    %c0_i32_1 = arith.constant 0 : i32
    return %c0_i32, %c0_i32_0 : i32, i32
  }
  func.func @transform_6(%arg0: i32) -> (i32, i32, i32) {
    %c0_i32 = arith.constant 0 : i32
    %c0_i32_0 = arith.constant 0 : i32
    %c0_i32_1 = arith.constant 0 : i32
    return %arg0, %c0_i32, %c0_i32_0 : i32, i32, i32
  }
}

</mosaic_0001>

<bundles_post_ra>
// kernel: tpu_custom_call.1
= control target key start
LH: loop header
LB: loop body
LE: loop exit
PB: predicated region body
PF: predicated region fallthrough
CT: control target
= control target key end

     0   :  { %11 = vsyncpa [#allocation3], 0  ;;  %s2680_s0 = inlined_call_operand.vmem [shape: f32[2,4,256], index: 0, kind: input, shape index: {}]   ;;  %s2681_s1 = inlined_call_operand.hbm [shape: f32[6,36], index: 1, kind: input, shape index: {}]   ;;  %s2682_s2 = inlined_call_operand.vmem [shape: f32[6,1], index: 2, kind: input, shape index: {}]   ;;  %s2683_s3 = inlined_call_operand.hbm [shape: f32[6,54], index: 3, kind: input, shape index: {}]   ;;  %s2684_s4 = inlined_call_operand.vmem [shape: f32[6,1], index: 4, kind: input, shape index: {}]   ;;  %s2685_s5 = inlined_call_operand.hbm [shape: f32[9,256], index: 5, kind: input, shape index: {}]   ;;  %s2686_s6 = inlined_call_operand.vmem [shape: f32[2,6,256], index: 6, kind: output, shape index: {}]  }
   0x1   :  { %12 = vsyncpa [#allocation5], 0  ;;  %s1999_s21 = smov 0  }
   0x2 LB: > { %s207_s24 = sshll.u32 %s2683_s3, 4  ;;  %s2008_s25 = sadd.s32 4294967295, %s1895_s21   ;;  %s1895_s21 = sphi %s1999_s21, %s18_s21   ;;  %s208_s24 = int_to_ptr.hbm [resolvable:$true] %s207_s24 }
   0x3   : > { %p1577_p0 = scmp.ge.s32.totalorder %s1895_s21, 1  ;;  %p180_p1 = scmp.lt.s32.totalorder %s1895_s21, 3 }
   0x4   : > { %p1616_p2 = scmp.eq.s32.totalorder %s2008_s25, 0  ;;  %s1897_s27 = smov [#allocation4]  }
   0x5   : > { %p2013_p3 = pnand %p1577_p0, %p180_p1  ;;  %s209_s28 = sshll.u32 %s1897_s27, 4  ;;  %s210_s28 = int_to_ptr.vmem [resolvable:$true] %s209_s28 }
   0x6   : > { %s192_s7 = sshll.u32 %s2681_s1, 4  ;;  %s221_s10 = sshll.u32 %s2685_s5, 4  ;;  %s193_s7 = int_to_ptr.hbm [resolvable:$true] %s192_s7  ;;  %s222_s10 = int_to_ptr.hbm [resolvable:$true] %s221_s10 }
   0x7   : > { %p1606_p4 = pneg %p2013_p3  ;;  %s1898_s11 = smov [#allocation2]  }
   0x8   : > { %s194_s12 = sshll.u32 %s1898_s11, 4  ;;  %s1899_s13 = smov [#allocation6]   ;;  %s195_s12 = int_to_ptr.vmem [resolvable:$true] %s194_s12 }
   0x9   : > { %p1607_p5 = pnand %p1616_p2, %p1606_p4  ;;  %s223_s14 = sshll.u32 %s1899_s13, 4  ;;  %s224_s14 = int_to_ptr.vmem [resolvable:$true] %s223_s14 }
   0xa   : > { %s1900_s15 = smov 256   ;;  %s1901_s16 = smov 16  }
   0xb   : > { %1612 = dma.hbm_to_vmem [thread:$0]  (!%p1607_p5), %s208_s24, 128, %s210_s28, [#allocation5]  }
   0xc   : > { %1609 = dma.hbm_to_vmem [thread:$0]  (!%p1607_p5), %s193_s7, 128, %s195_s12, [#allocation3]  }
   0xd   : > { %1615 = dma.hbm_to_vmem [thread:$0]  (!%p1607_p5), %s222_s10, 512, %s224_s14, [#allocation5], %s1900_s15, %s1900_s15, %s1901_s16  }
   0xe   : > { %247 = sbr.rel (%p2013_p3) target bundleno = 623 (0x26f), region = 44 }
  0x13   : > { %1886 = dma.done.wait (%p1616_p2), [#allocation3], 128  }
  0x14   : > { %1888 = vsyncadd (%p1616_p2), [#allocation3], 4294967168 }
  0x15   : > { %1890 = dma.done.wait (%p1616_p2), [#allocation5], 640  }
  0x16   : > { %1892 = vsyncadd (%p1616_p2), [#allocation5], 4294966656  ;;  %p288_p6 = scmp.lt.s32.totalorder %s2008_s25, 1  ;;  %v2698_v0 = vmov 0   ;;  %v1903_v1 = vmov 18   ;;  %v1904_v2 = vmov 10   ;;  %v309_v57 = vlaneseq }
  0x17   : > { %1697 = vset.pattern.permute.xlu1 %v2698_v0  ;;  %1699 = vset.pattern.permute.xlu2 %v1903_v1  ;;  %v322_v3 = vld [vmem:[#allocation2] sm:$0x3f]  ;;  %v1905_v7 = vmov 9   ;;  %s1906_s22 = smov 17   ;;  %v1907_v8 = vmov 27   ;;  %v1908_v12 = vmov 19  }
  0x18   : > { %s2732_s25 = smov (!%p288_p6, %s2008_s25), 1  ;;  %1702 = vset.pattern.permute.xlu0 %v1904_v2  ;;  %325 = vperm.xlu1 %1697, %v322_v3   ;;  %v385_v9 = vld [vmem:[#allocation2] sm:$0x3f]  ;;  %v1909_v13 = vmov 1   ;;  %s1910_s23 = smov 16   ;;  %v1911_v16 = vmov 11  }
  0x19   : > { %s1592_s17 = sshll.u32 %s2732_s25, 3  ;;  %345 = vperm.xlu2 %1699, %v322_v3   ;;  %v1912_v17 = vmov 28   ;;  %s1913_s24 = smov 15   ;;  %v1914_v19 = vmov 20   ;;  %v448_v21 = vld [vmem:[#allocation2] sm:$0x3f] }
  0x1a   : > { %s292_s20 = scalar_lea.vmem %s2680_s0, %s1592_s17  ;;  %v1915_v22 = vmov 2   ;;  %s1916_s26 = smov 1   ;;  %v1917_v23 = vmov 29   ;;  %v1918_v24 = vmov 21   ;;  %v1919_v25 = vmov 12  }
  0x1b   : > { %v2048_v4 = vld [vmem:[%s292_s20] sm:$0xff]  ;;  %v511_v26 = vld [vmem:[#allocation2] sm:$0x3f]  ;;  %v1920_v27 = vmov 3   ;;  %v1921_v28 = vmov 31   ;;  %v1922_v29 = vmov 30  }
  0x1c   : > { %300 = vst [vmem:[#allocation1] ss:$2 sm:$0xff] %v2048_v4  ;;  %v1923_v30 = vmov 4   ;;  %v630_v33 = vld [vmem:[#allocation2] sm:$0x3f]  ;;  %v1924_v34 = vmov 23  }
  0x1d   : > { %v1925_v35 = vmov 13   ;;  %v1926_v36 = vmov 22   ;;  %v693_v37 = vld [vmem:[#allocation2] sm:$0x3f]  ;;  %v1927_v38 = vmov 15   ;;  %s1928_s27 = smov 127  }
  0x1e   : > { %v2706_v41 = vmov 5   ;;  %v1930_v42 = vmov 14   ;;  %v2688_v47 = vmov 7   ;;  %v2094_v48 = vld [vmem:[#allocation2] sm:$0x3f]  ;;  %v2705_v49 = vmov 32  }
  0x1f   : > { %s1933_s28 = smov 113   ;;  %v2691_v50 = vmov 6   ;;  %v2704_v52 = vmov 24   ;;  %s1936_s29 = smov 111   ;;  %v2690_v56 = vmov 33   ;;  %v2687_v60 = vmov 26  }
  0x20   : > { %1698 = vset.pattern.permute.xlu1 %v1905_v7  ;;  %v2108_v58 = vld [vmem:[#allocation2] sm:$0x3f]  ;;  %v2112_v62 = vand.u32 127, %v309_v57  ;;  %v2114_v63 = vld [vmem:[#allocation6] ss:$8 sm:$0x3] }
  0x21   : > { %335 = vperm.xlu1 %1698, %v322_v3   ;;  %1700 = vset.pattern.permute.xlu2 %v1907_v8  ;;  %s1939_s30 = smov 112   ;;  %s1593_s11 = sshll.u32 %s2732_s25, 4 }
  0x22   : > { %355 = vperm.xlu2 %1700, %v322_v3   ;;  %vm311_vm0 = vcmp.lt.s32.totalorder %v2112_v62, 17  ;;  %v2701_v3 = vperm.slane %v2114_v63, 0  ;;  %vm373_vm1 = vcmp.lt.s32.totalorder %v2112_v62, 16  ;;  %vm436_vm2 = vcmp.lt.s32.totalorder %v2112_v62, 15  ;;  %s297_s14 = scalar_lea.vmem %s2686_s6, %s1593_s11 }
  0x23   : > { %v301_v5 = vld.sshfl [vmem:[#allocation1] sm:$0xff pattern:$0x75316420]  ;;  %v302_v6 = vld.sshfl [vmem:[#allocation1 + $0x8] sm:$0xff pattern:$0x75316420] }
  0x24   : > { %305 = vrot.lane.b32.xlu0 %v301_v5, %s1906_s22  ;;  %364 = vst [vmem:[#allocation1] ss:$2 sm:$0xff] %v2048_v4  ;;  %v2695_v5 = vperm.slane %v2114_v63, 1  ;;  %vm499_vm3 = vcmp.lt.s32.totalorder %v2112_v62, 1  ;;  %vm618_vm4 = vcmp.lt.s32.totalorder %v2112_v62, 127  ;;  %vm681_vm5 = vcmp.lt.s32.totalorder %v2112_v62, 113 }
  0x25   : > { %vm744_vm6 = vcmp.lt.s32.totalorder %v2112_v62, 112  ;;  %vm807_vm7 = vcmp.lt.s32.totalorder %v2112_v62, 111 }
  0x29   : > { %1703 = vset.pattern.permute.xlu1 %v1908_v12 }
  0x2a   : > { %408 = vperm.xlu1 %1703, %v385_v9   ;;  %1701 = vset.pattern.permute.xlu2 %v1909_v13 }
  0x2b   : > { %v365_v10 = vld.sshfl [vmem:[#allocation1] sm:$0xff pattern:$0x75316420]  ;;  %v366_v11 = vld.sshfl [vmem:[#allocation1 + $0x8] sm:$0xff pattern:$0x75316420]  ;;  %388 = vperm.xlu2 %1701, %v385_v9  }
  0x2c   : > { %307 = vrot.lane.b32.xlu0 %v302_v6, %s1906_s22  ;;  %427 = vst [vmem:[#allocation1] ss:$2 sm:$0xff] %v2048_v4  ;;  %v1940_v6 = vmov 16  }
  0x32   : > { %371 = vrot.lane.b32.xlu1 %v366_v11, %s1910_s23 }
  0x33   : > { %v428_v14 = vld.sshfl [vmem:[#allocation1] sm:$0xff pattern:$0x75316420]  ;;  %v429_v15 = vld.sshfl [vmem:[#allocation1 + $0x8] sm:$0xff pattern:$0x75316420]  ;;  %1706 = vset.pattern.permute.xlu1 %v1911_v16  ;;  %1704 = vset.pattern.permute.xlu2 %v1912_v17 }
  0x34   : > { %369 = vrot.lane.b32.xlu0 %v365_v10, %s1910_s23  ;;  %490 = vst [vmem:[#allocation1] ss:$2 sm:$0xff] %v2048_v4  ;;  %418 = vperm.xlu2 %1704, %v385_v9   ;;  %v2689_v10 = vmov 25  }
  0x3a   : > { %432 = vrot.lane.b32.xlu1 %v428_v14, %s1913_s24 }
  0x3b   : > { %v492_v18 = vld.sshfl [vmem:[#allocation1 + $0x8] sm:$0xff pattern:$0x75316420]  ;;  %v491_v20 = vld.sshfl [vmem:[#allocation1] sm:$0xff pattern:$0x75316420] }
  0x3c   : > { %398 = vperm.xlu0 %1702, %v385_v9   ;;  %434 = vrot.lane.b32.xlu2 %v429_v15, %s1913_s24  ;;  %609 = vst [vmem:[#allocation1] ss:$2 sm:$0xff] %v2048_v4 }
  0x3d   : > { %1707 = vset.pattern.permute.xlu2 %v1914_v19 }
  0x42   : > { %461 = vperm.xlu1 %1706, %v448_v21  }
  0x43   : > { %v610_v31 = vld.sshfl [vmem:[#allocation1] sm:$0xff pattern:$0x75316420]  ;;  %v611_v32 = vld.sshfl [vmem:[#allocation1 + $0x8] sm:$0xff pattern:$0x75316420] }
  0x44   : > { %1705 = vset.pattern.permute.xlu0 %v1915_v22  ;;  %471 = vperm.xlu2 %1707, %v448_v21   ;;  %672 = vst [vmem:[#allocation1] ss:$2 sm:$0xff] %v2048_v4 }
  0x45   : > { %451 = vperm.xlu0 %1705, %v448_v21  }
  0x4a   : > { %1708 = vset.pattern.permute.xlu1 %v1917_v23 }
  0x4b   : > { %481 = vperm.xlu1 %1708, %v448_v21   ;;  %v674_v39 = vld.sshfl [vmem:[#allocation1 + $0x8] sm:$0xff pattern:$0x75316420]  ;;  %v673_v40 = vld.sshfl [vmem:[#allocation1] sm:$0xff pattern:$0x75316420] }
  0x4c   : > { %495 = vrot.lane.b32.xlu2 %v491_v20, %s1916_s26  ;;  %735 = vst [vmem:[#allocation1] ss:$2 sm:$0xff] %v2048_v4 }
  0x4d   : > { %497 = vrot.lane.b32.xlu0 %v492_v18, %s1916_s26  ;;  %1710 = vset.pattern.permute.xlu2 %v1919_v25 }
  0x4e   : > { %1711 = vset.pattern.permute.xlu0 %v1918_v24 }
  0x53   : > { %1709 = vset.pattern.permute.xlu1 %v1920_v27  ;;  %v737_v44 = vld.sshfl [vmem:[#allocation1 + $0x8] sm:$0xff pattern:$0x75316420]  ;;  %v736_v45 = vld.sshfl [vmem:[#allocation1] sm:$0xff pattern:$0x75316420] }
  0x54   : > { %514 = vperm.xlu1 %1709, %v511_v26   ;;  %524 = vperm.xlu2 %1710, %v511_v26   ;;  %798 = vst [vmem:[#allocation1] ss:$2 sm:$0xff] %v2048_v4 }
  0x55   : > { %534 = vperm.xlu0 %1711, %v511_v26  }
  0x5b   : > { %v800_v54 = vld.sshfl [vmem:[#allocation1 + $0x8] sm:$0xff pattern:$0x75316420] }
  0x5c   : > { %1712 = vset.pattern.permute.xlu1 %v1922_v29  ;;  %1713 = vset.pattern.permute.xlu2 %v1923_v30 }
  0x5d   : > { %1716 = vset.pattern.permute.xlu0 %v1921_v28  ;;  %544 = vperm.xlu1 %1712, %v511_v26  }
  0x5e   : > { %596 = vperm.xlu0 %1716, %v511_v26   ;;  %554 = vperm.xlu2 %1713, %v511_v26  }
  0x65   : > { %1714 = vset.pattern.permute.xlu1 %v1925_v35 }
  0x66   : > { %1719 = vset.pattern.permute.xlu0 %v1924_v34  ;;  %1715 = vset.pattern.permute.xlu2 %v1926_v36 }
  0x67   : > { %653 = vperm.xlu0 %1719, %v630_v33   ;;  %568 = vperm.xlu1 %1714, %v511_v26  }
  0x68   : > { %582 = vperm.xlu2 %1715, %v511_v26   ;;  %v2134_v26 = vld [vmem:[#allocation6 + $0x1] ss:$8 sm:$0x3] }
  0x6f   : > { %1722 = vset.pattern.permute.xlu0 %v1927_v38  ;;  %614 = vrot.lane.b32.xlu1 %v610_v31, %s1928_s27 }
  0x70   : > { %706 = vperm.xlu0 %1722, %v693_v37   ;;  %616 = vrot.lane.b32.xlu2 %v611_v32, %s1928_s27 }
  0x71   : > { %1717 = vset.pattern.permute.xlu1 %v2706_v41  ;;  %1718 = vset.pattern.permute.xlu2 %v1930_v42 }
  0x73   : > { %v2088_v43 = vpop.permute.xlu2 %345 }
  0x77   : > { %633 = vperm.xlu1 %1717, %v630_v33  }
  0x78   : > { %643 = vperm.xlu2 %1718, %v630_v33   ;;  %1725 = vset.pattern.permute.xlu0 %v2688_v47 }
  0x79   : > { %759 = vperm.xlu0 %1725, %v2094_v48  }
  0x7c   : > { %v2091_v46 = vpop.permute.xlu2 %355 }
  0x7f   : > { %1720 = vset.pattern.permute.xlu1 %v2705_v49 }
  0x80   : > { %677 = vrot.lane.b32.xlu2 %v673_v40, %s1933_s28  ;;  %663 = vperm.xlu1 %1720, %v630_v33  }
  0x81   : > { %1721 = vset.pattern.permute.xlu2 %v2691_v50  ;;  %805 = vrot.lane.b32.xlu0 %v800_v54, %s1936_s29 }
  0x82   : > { %1731 = vset.pattern.permute.xlu0 %v2687_v60 }
  0x85   : > { %v2100_v51 = vpop.permute.xlu2 %388 }
  0x88   : > { %696 = vperm.xlu2 %1721, %v693_v37   ;;  %679 = vrot.lane.b32.xlu1 %v674_v39, %s1933_s28 }
  0x89   : > { %1723 = vset.pattern.permute.xlu1 %v2704_v52  ;;  %842 = vperm.xlu0 %1731, %v2108_v58  }
  0x8a   : > { %v326_v53 = vpop.permute.xlu1 %325 }
  0x8e   : > { %v2105_v55 = vpop.permute.xlu2 %418 }
  0x90   : > { %1724 = vset.pattern.permute.xlu2 %v2690_v56  ;;  %716 = vperm.xlu1 %1723, %v693_v37  }
  0x91   : > { %726 = vperm.xlu2 %1724, %v693_v37   ;;  %1734 = vset.pattern.permute.xlu0 %v2698_v0 }
  0x93   : > { %v336_v61 = vpop.permute.xlu1 %335 }
  0x96   : > { %v306_v59 = vpop.permute.xlu0 %305  ;;  %v2122_v9 = vpop.permute.xlu2 %434 }
  0x98   : > { %740 = vrot.lane.b32.xlu1 %v736_v45, %s1939_s30 }
  0x99   : > { %742 = vrot.lane.b32.xlu2 %v737_v44, %s1939_s30  ;;  %1726 = vset.pattern.permute.xlu1 %v1940_v6 }
  0x9a   : > { %1727 = vset.pattern.permute.xlu2 %v2689_v10 }
  0x9c   : > { %v409_v21 = vpop.permute.xlu1 %408 }
  0x9e   : > { %v308_v11 = vpop.permute.xlu0 %307  ;;  %v2143_v56 = vpop.permute.xlu2 %471 }
  0x9f   : > { %v312_v14 = vsel %vm311_vm0, %v306_v59, %v308_v11  ;;  %v313_v15 = vsel %vm311_vm0, %v308_v11, %v306_v59 }
  0xa0   : > { %v320_v18 = vmul.f32 %v2701_v3, %v313_v15  ;;  %v321_v20 = vmul.f32 %v2695_v5, %v312_v14  ;;  %769 = vperm.xlu1 %1726, %v2094_v48   ;;  %v2694_v14 = vperm.slane %v2134_v26, 0  ;;  %v2693_v15 = vperm.slane %v2134_v26, 1 }
  0xa1   : > { %779 = vperm.xlu2 %1727, %v2094_v48   ;;  %v2696_v5 = vmov 17  }
  0xa2   : > { %v328_v31 = vperm.slane %v320_v18, 0  ;;  %v329_v32 = vperm.slane %v321_v20, 0  ;;  %v338_v33 = vperm.slane %v320_v18, 1  ;;  %v339_v37 = vperm.slane %v321_v20, 1 }
  0xa3   : > { %v348_v39 = vperm.slane %v320_v18, 2  ;;  %v349_v40 = vperm.slane %v321_v20, 2  ;;  %v358_v44 = vperm.slane %v320_v18, 3  ;;  %v359_v45 = vperm.slane %v321_v20, 3 }
  0xa4   : > { %v330_v54 = vmul.f32 %v328_v31, %v326_v53  ;;  %v331_v57 = vmul.f32 %v329_v32, %v326_v53  ;;  %v340_v59 = vmul.f32 %v338_v33, %v336_v61  ;;  %v341_v11 = vmul.f32 %v339_v37, %v336_v61  ;;  %v372_v50 = vpop.permute.xlu1 %371  ;;  %v799_v33 = vld.sshfl [vmem:[#allocation1] sm:$0xff pattern:$0x75316420] }
  0xa5   : > { %v350_v18 = vmul.f32 %v348_v39, %v2088_v43  ;;  %v351_v20 = vmul.f32 %v349_v40, %v2088_v43  ;;  %v360_v61 = vmul.f32 %v358_v44, %v2091_v46  ;;  %v361_v32 = vmul.f32 %v359_v45, %v2091_v46 }
  0xa6   : > { %v370_v60 = vpop.permute.xlu0 %369  ;;  %v342_v47 = vadd.f32 %v340_v59, %v330_v54  ;;  %v343_v10 = vadd.f32 %v341_v11, %v331_v57 }
  0xa7   : > { %v374_v37 = vsel %vm373_vm1, %v370_v60, %v372_v50  ;;  %v375_v54 = vsel %vm373_vm1, %v372_v50, %v370_v60 }
  0xa8   : > { %v352_v31 = vadd.f32 %v350_v18, %v342_v47  ;;  %v353_v53 = vadd.f32 %v351_v20, %v343_v10  ;;  %v383_v39 = vmul.f32 %v2694_v14, %v375_v54  ;;  %v384_v43 = vmul.f32 %v2693_v15, %v374_v37  ;;  %v496_v20 = vpop.permute.xlu2 %495 }
  0xa9   : > { %v2692_v10 = vmov 34   ;;  %803 = vrot.lane.b32.xlu2 %v799_v33, %s1936_s29 }
  0xaa   : > { %v362_v40 = vadd.f32 %v360_v61, %v352_v31  ;;  %v363_v47 = vadd.f32 %v361_v32, %v353_v53  ;;  %1728 = vset.pattern.permute.xlu1 %v2692_v10  ;;  %v391_v46 = vperm.slane %v383_v39, 0  ;;  %v392_v44 = vperm.slane %v384_v43, 0  ;;  %1730 = vset.pattern.permute.xlu2 %v2696_v5 }
  0xab   : > { %789 = vperm.xlu1 %1728, %v2094_v48   ;;  %v401_v45 = vperm.slane %v383_v39, 1  ;;  %v402_v57 = vperm.slane %v384_v43, 1  ;;  %v411_v59 = vperm.slane %v383_v39, 2  ;;  %v412_v11 = vperm.slane %v384_v43, 2 }
  0xac   : > { %v393_v50 = vmul.f32 %v391_v46, %v2100_v51  ;;  %v394_v60 = vmul.f32 %v392_v44, %v2100_v51  ;;  %v433_v37 = vpop.permute.xlu1 %432  ;;  %v421_v33 = vperm.slane %v383_v39, 3  ;;  %v422_v54 = vperm.slane %v384_v43, 3 }
  0xad   : > { %v413_v48 = vmul.f32 %v411_v59, %v409_v21  ;;  %v414_v10 = vmul.f32 %v412_v11, %v409_v21  ;;  %v2697_v44 = vmov 8  }
  0xae   : > { %v399_v18 = vpop.permute.xlu0 %398  ;;  %v395_v61 = vadd.f32 %v393_v50, %v362_v40  ;;  %v396_v32 = vadd.f32 %v394_v60, %v363_v47  ;;  %v423_v40 = vmul.f32 %v421_v33, %v2105_v55  ;;  %v424_v47 = vmul.f32 %v422_v54, %v2105_v55  ;;  %v2178_v50 = vld [vmem:[#allocation6 + $0x2] ss:$8 sm:$0x3] }
  0xaf   : > { %v403_v31 = vmul.f32 %v401_v45, %v399_v18  ;;  %v404_v53 = vmul.f32 %v402_v57, %v399_v18  ;;  %v861_v57 = vld [vmem:[%s2682_s2] sm:$0x3f]  ;;  %v2703_v59 = vperm.slane %v2178_v50, 0  ;;  %v2702_v18 = vperm.slane %v2178_v50, 1 }
  0xb0   : > { %v2166_v45 = vpop.permute.xlu2 %524 }
  0xb1   : > { %v405_v15 = vadd.f32 %v403_v31, %v395_v61  ;;  %v406_v14 = vadd.f32 %v404_v53, %v396_v32  ;;  %832 = vperm.xlu2 %1730, %v2108_v58   ;;  %v2197_v61 = vld [vmem:[#allocation6 + $0x3] ss:$8 sm:$0x3] }
  0xb3   : > { %v415_v51 = vadd.f32 %v413_v48, %v405_v15  ;;  %v416_v46 = vadd.f32 %v414_v10, %v406_v14  ;;  %1729 = vset.pattern.permute.xlu1 %v2697_v44  ;;  %v2700_v14 = vmov 35  }
  0xb4   : > { %822 = vperm.xlu1 %1729, %v2108_v58   ;;  %v462_v43 = vpop.permute.xlu1 %461 }
  0xb5   : > { %v425_v39 = vadd.f32 %v423_v40, %v415_v51  ;;  %v426_v21 = vadd.f32 %v424_v47, %v416_v46  ;;  %v2707_v46 = vperm.slane %v2197_v61, 1 }
  0xb7   : > { %v452_v11 = vpop.permute.xlu0 %451 }
  0xb8   : > { %v2174_v15 = vpop.permute.xlu2 %554 }
  0xb9   : > { %1733 = vset.pattern.permute.xlu2 %v2698_v0 }
  0xba   : > { %864 = vperm.xlu2 %1733, %v861_v57  }
  0xbc   : > { %1732 = vset.pattern.permute.xlu1 %v2700_v14 }
  0xbd   : > { %852 = vperm.xlu1 %1732, %v2108_v58   ;;  %v482_v55 = vpop.permute.xlu1 %481  ;;  %v438_v58 = vsel %vm436_vm2, %v2122_v9, %v433_v37 }
  0xbf   : > { %v498_v54 = vpop.permute.xlu0 %497 }
  0xc0   : > { %v501_v40 = vsel %vm499_vm3, %v498_v54, %v496_v20  ;;  %v500_v57 = vsel %vm499_vm3, %v496_v20, %v498_v54 }
  0xc2   : > { %1736 = vset.pattern.permute.xlu2 %v1903_v1  ;;  %v2180_v60 = vpop.permute.xlu2 %582  ;;  %v437_v1 = vsel %vm436_vm2, %v433_v37, %v2122_v9  ;;  %v2708_v9 = vperm.slane %v2197_v61, 0 }
  0xc3   : > { %v447_v53 = vmul.f32 %v2702_v18, %v437_v1 }
  0xc5   : > { %1735 = vset.pattern.permute.xlu1 %v1905_v7  ;;  %v446_v7 = vmul.f32 %v2703_v59, %v438_v58  ;;  %v455_v48 = vperm.slane %v447_v53, 0  ;;  %v465_v58 = vperm.slane %v447_v53, 1  ;;  %v475_v3 = vperm.slane %v447_v53, 2 }
  0xc6   : > { %v515_v10 = vpop.permute.xlu1 %514  ;;  %v485_v49 = vperm.slane %v447_v53, 3  ;;  %v2221_v53 = vld [vmem:[#allocation4] sm:$0x3f] }
  0xc7   : > { %v454_v33 = vperm.slane %v446_v7, 0  ;;  %v457_v37 = vmul.f32 %v455_v48, %v452_v11  ;;  %v464_v47 = vperm.slane %v446_v7, 1  ;;  %v467_v14 = vmul.f32 %v465_v58, %v462_v43  ;;  %892 = vperm.xlu1 %1735, %v2221_v53   ;;  %902 = vperm.xlu2 %1736, %v2221_v53  }
  0xc8   : > { %v474_v48 = vperm.slane %v446_v7, 2  ;;  %v484_v52 = vperm.slane %v446_v7, 3  ;;  %882 = vperm.xlu0 %1734, %v2221_v53  }
  0xc9   : > { %v456_v51 = vmul.f32 %v454_v33, %v452_v11  ;;  %v466_v44 = vmul.f32 %v464_v47, %v462_v43  ;;  %v509_v33 = vmul.f32 %v2708_v9, %v501_v40  ;;  %v459_v0 = vadd.f32 %v457_v37, %v426_v21 }
  0xca   : > { %v2199_v32 = vpop.permute.xlu2 %616  ;;  %v510_v11 = vmul.f32 %v2707_v46, %v500_v57  ;;  %v477_v40 = vmul.f32 %v475_v3, %v2143_v56  ;;  %v487_v21 = vmul.f32 %v485_v49, %v482_v55  ;;  %v535_v49 = vpop.permute.xlu0 %534 }
  0xcb   : > { %v458_v5 = vadd.f32 %v456_v51, %v425_v39  ;;  %v517_v20 = vperm.slane %v509_v33, 0  ;;  %v469_v54 = vadd.f32 %v467_v14, %v459_v0  ;;  %v476_v39 = vmul.f32 %v474_v48, %v2143_v56 }
  0xcc   : > { %v518_v41 = vperm.slane %v510_v11, 0  ;;  %v486_v51 = vmul.f32 %v484_v52, %v482_v55  ;;  %v527_v47 = vperm.slane %v509_v33, 1  ;;  %v528_v46 = vperm.slane %v510_v11, 1 }
  0xcd   : > { %v468_v59 = vadd.f32 %v466_v44, %v458_v5  ;;  %v519_v57 = vmul.f32 %v517_v20, %v515_v10  ;;  %v479_v58 = vadd.f32 %v477_v40, %v469_v54  ;;  %v537_v7 = vperm.slane %v509_v33, 2 }
  0xce   : > { %v520_v9 = vmul.f32 %v518_v41, %v515_v10  ;;  %v529_v0 = vmul.f32 %v527_v47, %v2166_v45  ;;  %v530_v52 = vmul.f32 %v528_v46, %v2166_v45  ;;  %v538_v3 = vperm.slane %v510_v11, 2 }
  0xcf   : > { %v2193_v31 = vpop.permute.xlu1 %544  ;;  %v478_v37 = vadd.f32 %v476_v39, %v468_v59  ;;  %v489_v44 = vadd.f32 %v487_v21, %v479_v58  ;;  %v557_v59 = vperm.slane %v2048_v4, 0  ;;  %v558_v41 = vperm.slane %v2048_v4, 4  ;;  %1737 = vset.pattern.permute.xlu1 %v1907_v8 }
  0xd0   : > { %v539_v20 = vmul.f32 %v537_v7, %v535_v49  ;;  %v547_v45 = vperm.slane %v509_v33, 3  ;;  %v540_v54 = vmul.f32 %v538_v3, %v535_v49  ;;  %v548_v39 = vperm.slane %v510_v11, 3  ;;  %912 = vperm.xlu1 %1737, %v2221_v53  }
  0xd1   : > { %v488_v5 = vadd.f32 %v486_v51, %v478_v37  ;;  %v522_v56 = vadd.f32 %v520_v9, %v489_v44  ;;  %v571_v9 = vperm.slane %v2048_v4, 1  ;;  %v572_v51 = vperm.slane %v2048_v4, 5 }
  0xd2   : > { %v2214_v18 = vpop.permute.xlu2 %643  ;;  %v561_v40 = vperm.slane %v557_v59, 0  ;;  %v549_v21 = vmul.f32 %v547_v45, %v2193_v31  ;;  %v562_v37 = vperm.slane %v558_v41, 0  ;;  %v550_v47 = vmul.f32 %v548_v39, %v2193_v31 }
  0xd3   : > { %v521_v14 = vadd.f32 %v519_v57, %v488_v5  ;;  %v532_v46 = vadd.f32 %v530_v52, %v522_v56  ;;  %v585_v57 = vperm.slane %v2048_v4, 2  ;;  %v586_v5 = vperm.slane %v2048_v4, 6 }
  0xd4   : > { %v575_v44 = vperm.slane %v571_v9, 1  ;;  %v563_v11 = vmul.f32 %v561_v40, %v2174_v15  ;;  %v564_v31 = vmul.f32 %v562_v37, %v2174_v15  ;;  %v599_v41 = vperm.slane %v2048_v4, 3 }
  0xd5   : > { %v531_v48 = vadd.f32 %v529_v0, %v521_v14  ;;  %v542_v33 = vadd.f32 %v540_v54, %v532_v46  ;;  %v576_v0 = vperm.slane %v572_v51, 1  ;;  %v2239_v14 = vld [vmem:[#allocation6 + $0x5] ss:$8 sm:$0x3]  ;;  %v589_v56 = vperm.slane %v585_v57, 2  ;;  %v597_v51 = vpop.permute.xlu0 %596 }
  0xd6   : > { %v590_v3 = vperm.slane %v586_v5, 2  ;;  %v624_v8 = vperm.slane %v2239_v14, 0  ;;  %v600_v45 = vperm.slane %v2048_v4, 7  ;;  %v625_v9 = vperm.slane %v2239_v14, 1 }
  0xd7   : > { %v541_v58 = vadd.f32 %v539_v20, %v531_v48  ;;  %v552_v52 = vadd.f32 %v550_v47, %v542_v33  ;;  %v591_v40 = vmul.f32 %v589_v56, %v2180_v60 }
  0xd8   : > { %v592_v37 = vmul.f32 %v590_v3, %v2180_v60  ;;  %v604_v57 = vperm.slane %v600_v45, 3  ;;  %1740 = vset.pattern.permute.xlu1 %v1909_v13  ;;  %v1946_v45 = vmov 36  }
  0xd9   : > { %v2208_v1 = vpop.permute.xlu1 %568  ;;  %v551_v7 = vadd.f32 %v549_v21, %v541_v58  ;;  %v566_v39 = vadd.f32 %v564_v31, %v552_v52  ;;  %v603_v21 = vperm.slane %v599_v41, 3  ;;  %950 = vperm.xlu1 %1740, %v2221_v53   ;;  %1738 = vset.pattern.permute.xlu2 %v1946_v45 }
  0xda   : > { %v2224_v55 = vpop.permute.xlu2 %677  ;;  %v577_v59 = vmul.f32 %v575_v44, %v2208_v1  ;;  %v578_v20 = vmul.f32 %v576_v0, %v2208_v1  ;;  %v2272_v44 = vld [vmem:[#allocation6 + $0x6] ss:$8 sm:$0x3]  ;;  %922 = vperm.xlu2 %1738, %v2221_v53  }
  0xdb   : > { %v565_v46 = vadd.f32 %v563_v11, %v551_v7  ;;  %v606_v11 = vmul.f32 %v604_v57, %v597_v51  ;;  %v687_v13 = vperm.slane %v2272_v44, 0  ;;  %v688_v56 = vperm.slane %v2272_v44, 1 }
  0xdc   : > { %v580_v47 = vadd.f32 %v578_v20, %v566_v39 }
  0xdd   : > { %v579_v1 = vadd.f32 %v577_v59, %v565_v46  ;;  %v654_v46 = vpop.permute.xlu0 %653 }
  0xde   : > { %v594_v0 = vadd.f32 %v592_v37, %v580_v47 }
  0xe1   : > { %v2218_v43 = vpop.permute.xlu1 %614  ;;  %1743 = vset.pattern.permute.xlu1 %v1912_v17 }
  0xe2   : > { %v2246_v49 = vpop.permute.xlu2 %696  ;;  %v619_v15 = vsel %vm618_vm4, %v2218_v43, %v2199_v32  ;;  %v620_v54 = vsel %vm618_vm4, %v2199_v32, %v2218_v43  ;;  %v593_v32 = vadd.f32 %v591_v40, %v579_v1  ;;  %v605_v43 = vmul.f32 %v603_v21, %v597_v51  ;;  %980 = vperm.xlu1 %1743, %v2221_v53  }
  0xe3   : > { %v628_v4 = vmul.f32 %v624_v8, %v619_v15  ;;  %v629_v58 = vmul.f32 %v625_v9, %v620_v54  ;;  %v608_v15 = vadd.f32 %v606_v11, %v594_v0  ;;  %1741 = vset.pattern.permute.xlu2 %v1904_v2  ;;  %v1948_v2 = vmov 46  }
  0xe4   : > { %v607_v3 = vadd.f32 %v605_v43, %v593_v32  ;;  %960 = vperm.xlu2 %1741, %v2221_v53  }
  0xe5   : > { %v636_v5 = vperm.slane %v628_v4, 0  ;;  %v637_v7 = vperm.slane %v629_v58, 0  ;;  %v646_v59 = vperm.slane %v628_v4, 1  ;;  %v647_v54 = vperm.slane %v629_v58, 1 }
  0xe6   : > { %v657_v37 = vperm.slane %v629_v58, 2  ;;  %v666_v32 = vperm.slane %v628_v4, 3 }
  0xe7   : > { %v648_v1 = vmul.f32 %v646_v59, %v2214_v18  ;;  %v649_v47 = vmul.f32 %v647_v54, %v2214_v18  ;;  %v2304_v59 = vld [vmem:[#allocation6 + $0x7] ss:$8 sm:$0x3] }
  0xe8   : > { %v659_v17 = vmul.f32 %v657_v37, %v654_v46  ;;  %v751_v45 = vperm.slane %v2304_v59, 1 }
  0xe9   : > { %v2231_v10 = vpop.permute.xlu1 %633 }
  0xea   : > { %v638_v31 = vmul.f32 %v636_v5, %v2231_v10  ;;  %v639_v52 = vmul.f32 %v637_v7, %v2231_v10  ;;  %v667_v5 = vperm.slane %v629_v58, 3  ;;  %1745 = vset.pattern.permute.xlu1 %v1948_v2 }
  0xeb   : > { %v2275_v60 = vpop.permute.xlu2 %726  ;;  %1000 = vperm.xlu1 %1745, %v2221_v53  }
  0xec   : > { %v640_v10 = vadd.f32 %v638_v31, %v607_v3  ;;  %v641_v39 = vadd.f32 %v639_v52, %v608_v15  ;;  %v707_v3 = vpop.permute.xlu0 %706 }
  0xee   : > { %v650_v57 = vadd.f32 %v648_v1, %v640_v10  ;;  %v651_v43 = vadd.f32 %v649_v47, %v641_v39 }
  0xf0   : > { %v661_v58 = vadd.f32 %v659_v17, %v651_v43 }
  0xf2   : > { %v2251_v48 = vpop.permute.xlu1 %663 }
  0xf3   : > { %v743_v11 = vpop.permute.xlu2 %742  ;;  %v668_v31 = vmul.f32 %v666_v32, %v2251_v48  ;;  %v669_v52 = vmul.f32 %v667_v5, %v2251_v48  ;;  %v750_v48 = vperm.slane %v2304_v59, 0  ;;  %1746 = vset.pattern.permute.xlu1 %v1915_v22 }
  0xf5   : > { %v671_v54 = vadd.f32 %v669_v52, %v661_v58 }
  0xfa   : > { %v680_v33 = vpop.permute.xlu1 %679 }
  0xfb   : > { %v682_v41 = vsel %vm681_vm5, %v2224_v55, %v680_v33  ;;  %v683_v20 = vsel %vm681_vm5, %v680_v33, %v2224_v55  ;;  %v656_v55 = vperm.slane %v628_v4, 2  ;;  %v1947_v4 = vmov 45  }
  0xfc   : > { %v2290_v51 = vmul.f32 %v687_v13, %v682_v41  ;;  %v2294_v40 = vmul.f32 %v688_v56, %v683_v20  ;;  %1739 = vset.pattern.permute.xlu0 %v1947_v4  ;;  %v1949_v4 = vmov 37  }
  0xfd   : > { %v658_v7 = vmul.f32 %v656_v55, %v654_v46  ;;  %932 = vperm.xlu0 %1739, %v2221_v53   ;;  %1744 = vset.pattern.permute.xlu2 %v1949_v4 }
  0xfe   : > { %v699_v33 = vperm.slane %v2290_v51, 0  ;;  %v700_v0 = vperm.slane %v2294_v40, 0  ;;  %v709_v10 = vperm.slane %v2290_v51, 1  ;;  %v710_v39 = vperm.slane %v2294_v40, 1  ;;  %990 = vperm.xlu2 %1744, %v2221_v53  }
  0xff   : > { %v660_v18 = vadd.f32 %v658_v7, %v650_v57  ;;  %v719_v47 = vperm.slane %v2290_v51, 2  ;;  %v720_v57 = vperm.slane %v2294_v40, 2  ;;  %v780_v7 = vpop.permute.xlu2 %779  ;;  %v730_v58 = vperm.slane %v2294_v40, 3 }
 0x100   : > { %v701_v41 = vmul.f32 %v699_v33, %v2246_v49  ;;  %v702_v20 = vmul.f32 %v700_v0, %v2246_v49  ;;  %v711_v32 = vmul.f32 %v709_v10, %v707_v3  ;;  %v712_v43 = vmul.f32 %v710_v39, %v707_v3  ;;  %v760_v0 = vpop.permute.xlu0 %759 }
 0x101   : > { %v670_v46 = vadd.f32 %v668_v31, %v660_v18  ;;  %v729_v3 = vperm.slane %v2290_v51, 3 }
 0x102   : > { %v717_v21 = vpop.permute.xlu1 %716  ;;  %v704_v37 = vadd.f32 %v702_v20, %v671_v54 }
 0x103   : > { %v703_v1 = vadd.f32 %v701_v41, %v670_v46  ;;  %v721_v17 = vmul.f32 %v719_v47, %v717_v21  ;;  %v732_v46 = vmul.f32 %v730_v58, %v2275_v60 }
 0x104   : > { %v714_v52 = vadd.f32 %v712_v43, %v704_v37 }
 0x105   : > { %v713_v31 = vadd.f32 %v711_v32, %v703_v1  ;;  %1742 = vset.pattern.permute.xlu0 %v1908_v12  ;;  %v2334_v12 = vld [vmem:[#allocation6 + $0x10] ss:$8 sm:$0x3] }
 0x106   : > { %970 = vperm.xlu0 %1742, %v2221_v53   ;;  %v813_v39 = vperm.slane %v2334_v12, 0  ;;  %1747 = vset.pattern.permute.xlu2 %v1911_v16 }
 0x107   : > { %v804_v40 = vpop.permute.xlu2 %803 }
 0x108   : > { %v806_v10 = vpop.permute.xlu0 %805 }
 0x109   : > { %v808_v22 = vsel %vm807_vm7, %v804_v40, %v806_v10 }
 0x10a   : > { %v741_v15 = vpop.permute.xlu1 %740 }
 0x10b   : > { %v745_v49 = vsel %vm744_vm6, %v741_v15, %v743_v11  ;;  %v746_v55 = vsel %vm744_vm6, %v743_v11, %v741_v15  ;;  %v722_v11 = vmul.f32 %v720_v57, %v717_v21  ;;  %v723_v15 = vadd.f32 %v721_v17, %v713_v31 }
 0x10c   : > { %v754_v5 = vmul.f32 %v750_v48, %v745_v49  ;;  %v755_v33 = vmul.f32 %v751_v45, %v746_v55  ;;  %v731_v21 = vmul.f32 %v729_v3, %v2275_v60  ;;  %v814_v49 = vperm.slane %v2334_v12, 1 }
 0x10d   : > { %v724_v2 = vadd.f32 %v722_v11, %v714_v52  ;;  %v809_v55 = vsel %vm807_vm7, %v806_v10, %v804_v40  ;;  %v817_v31 = vmul.f32 %v813_v39, %v808_v22 }
 0x10e   : > { %v762_v41 = vperm.slane %v754_v5, 0  ;;  %v763_v20 = vperm.slane %v755_v33, 0  ;;  %v733_v1 = vadd.f32 %v731_v21, %v723_v15  ;;  %v772_v47 = vperm.slane %v754_v5, 1  ;;  %1748 = vset.pattern.permute.xlu0 %v1914_v19 }
 0x10f   : > { %v734_v37 = vadd.f32 %v732_v46, %v724_v2  ;;  %v773_v57 = vperm.slane %v755_v33, 1  ;;  %v818_v52 = vmul.f32 %v814_v49, %v809_v55  ;;  %v782_v11 = vperm.slane %v754_v5, 2  ;;  %v833_v40 = vpop.permute.xlu2 %832 }
 0x110   : > { %v764_v54 = vmul.f32 %v762_v41, %v760_v0  ;;  %v765_v51 = vmul.f32 %v763_v20, %v760_v0  ;;  %v783_v4 = vperm.slane %v755_v33, 2  ;;  %v792_v41 = vperm.slane %v754_v5, 3 }
 0x111   : > { %v793_v20 = vperm.slane %v755_v33, 3  ;;  %v825_v19 = vperm.slane %v817_v31, 0  ;;  %v826_v15 = vperm.slane %v818_v52, 0  ;;  %v784_v2 = vmul.f32 %v782_v11, %v780_v7 }
 0x112   : > { %v770_v18 = vpop.permute.xlu1 %769  ;;  %v766_v60 = vadd.f32 %v764_v54, %v733_v1  ;;  %v767_v32 = vadd.f32 %v765_v51, %v734_v37  ;;  %v785_v21 = vmul.f32 %v783_v4, %v780_v7  ;;  %v835_v54 = vperm.slane %v817_v31, 1 }
 0x113   : > { %v774_v43 = vmul.f32 %v772_v47, %v770_v18  ;;  %v775_v0 = vmul.f32 %v773_v57, %v770_v18  ;;  %v836_v16 = vperm.slane %v818_v52, 1 }
 0x114   : > { %v837_v57 = vmul.f32 %v835_v54, %v833_v40 }
 0x115   : > { %v776_v3 = vadd.f32 %v774_v43, %v766_v60  ;;  %v777_v58 = vadd.f32 %v775_v0, %v767_v32  ;;  %v838_v60 = vmul.f32 %v836_v16, %v833_v40  ;;  %v845_v32 = vperm.slane %v817_v31, 2  ;;  %v843_v0 = vpop.permute.xlu0 %842 }
 0x116   : > { %v846_v43 = vperm.slane %v818_v52, 2 }
 0x117   : > { %v786_v51 = vadd.f32 %v784_v2, %v776_v3  ;;  %v787_v10 = vadd.f32 %v785_v21, %v777_v58  ;;  %v856_v3 = vperm.slane %v818_v52, 3  ;;  %v1951_v52 = vmov 47  }
 0x118   : > { %v848_v4 = vmul.f32 %v846_v43, %v843_v0 }
 0x11d   : > { %v790_v17 = vpop.permute.xlu1 %789 }
 0x11e   : > { %v794_v18 = vmul.f32 %v792_v41, %v790_v17  ;;  %v795_v46 = vmul.f32 %v793_v20, %v790_v17  ;;  %v847_v17 = vmul.f32 %v845_v32, %v843_v0  ;;  %v855_v41 = vperm.slane %v817_v31, 3 }
 0x11f   : > { %v1950_v31 = vmov 38   ;;  %v2712_v0 = vmov 24  }
 0x120   : > { %v796_v1 = vadd.f32 %v794_v18, %v786_v51  ;;  %v797_v55 = vadd.f32 %v795_v46, %v787_v10 }
 0x126   : > { %v823_v22 = vpop.permute.xlu1 %822 }
 0x127   : > { %v827_v37 = vmul.f32 %v825_v19, %v823_v22  ;;  %v828_v47 = vmul.f32 %v826_v15, %v823_v22  ;;  %v865_v19 = vpop.permute.xlu2 %864  ;;  %v2710_v22 = vmov 5  }
 0x129   : > { %v829_v5 = vadd.f32 %v827_v37, %v796_v1  ;;  %v830_v33 = vadd.f32 %v828_v47, %v797_v55  ;;  %v2711_v47 = vmov 32  }
 0x12b   : > { %v839_v7 = vadd.f32 %v837_v57, %v829_v5  ;;  %v840_v11 = vadd.f32 %v838_v60, %v830_v33  ;;  %v1956_v57 = vmov 41   ;;  %v1957_v33 = vmov 50  }
 0x12d   : > { %v849_v21 = vadd.f32 %v847_v17, %v839_v7  ;;  %v850_v18 = vadd.f32 %v848_v4, %v840_v11  ;;  %v2713_v4 = vperm.slane %v2178_v50, 0 }
 0x12f   : > { %v853_v58 = vpop.permute.xlu1 %852 }
 0x130   : > { %v857_v20 = vmul.f32 %v855_v41, %v853_v58  ;;  %v858_v2 = vmul.f32 %v856_v3, %v853_v58  ;;  %v2714_v3 = vperm.slane %v2178_v50, 1 }
 0x132   : > { %v859_v15 = vadd.f32 %v857_v20, %v849_v21  ;;  %v860_v46 = vadd.f32 %v858_v2, %v850_v18  ;;  %v2715_v21 = vperm.slane %v2114_v63, 0 }
 0x134   : > { %v867_v54 = vadd.f32 %v865_v19, %v859_v15  ;;  %v868_v16 = vadd.f32 %v865_v19, %v860_v46  ;;  %v2716_v19 = vperm.slane %v2114_v63, 1 }
 0x136   : > { %v2350_v51 = vmax.f32 %v867_v54, 0.0  ;;  %v2352_v10 = vmax.f32 %v868_v16, 0.0 }
 0x138   : > { %1011 = vrot.lane.b32.xlu0 %v2352_v10, %s1913_s24  ;;  %873 = vrot.lane.b32.xlu2 %v2352_v10, %s1906_s22  ;;  %v1200_v14 = vperm.slane %v2352_v10, 5 }
 0x139   : > { %871 = vrot.lane.b32.xlu1 %v2350_v51, %s1906_s22 }
 0x13a   : > { %v883_v40 = vpop.permute.xlu0 %882 }
 0x140   : > { %1038 = vperm.xlu0 %1748, %v2221_v53   ;;  %943 = vrot.lane.b32.xlu2 %v2352_v10, %s1910_s23 }
 0x141   : > { %941 = vrot.lane.b32.xlu1 %v2350_v51, %s1910_s23 }
 0x148   : > { %1079 = vrot.lane.b32.xlu0 %v2352_v10, %s1916_s26  ;;  %1009 = vrot.lane.b32.xlu2 %v2350_v51, %s1913_s24 }
 0x149   : > { %1018 = vperm.xlu1 %1746, %v2221_v53   ;;  %1754 = vset.pattern.permute.xlu0 %v1918_v24  ;;  %v1952_v24 = vmov 39  }
 0x150   : > { %1106 = vperm.xlu0 %1754, %v2221_v53   ;;  %1028 = vperm.xlu2 %1747, %v2221_v53  }
 0x151   : > { %1749 = vset.pattern.permute.xlu1 %v1917_v23  ;;  %v2389_v23 = vpop.permute.xlu2 %902 }
 0x152   : > { %1048 = vperm.xlu1 %1749, %v2221_v53  }
 0x158   : > { %1759 = vset.pattern.permute.xlu0 %v1925_v35  ;;  %1750 = vset.pattern.permute.xlu2 %v1950_v31 }
 0x159   : > { %1156 = vperm.xlu0 %1759, %v2221_v53   ;;  %1058 = vperm.xlu2 %1750, %v2221_v53  }
 0x15a   : > { %1751 = vset.pattern.permute.xlu1 %v1951_v52 }
 0x15b   : > { %1068 = vperm.xlu1 %1751, %v2221_v53  }
 0x161   : > { %1205 = vrot.lane.b32.xlu0 %v2350_v51, %s1928_s27  ;;  %1077 = vrot.lane.b32.xlu2 %v2350_v51, %s1916_s26 }
 0x162   : > { %1765 = vset.pattern.permute.xlu0 %v1930_v42  ;;  %1753 = vset.pattern.permute.xlu2 %v1919_v25  ;;  %v2397_v25 = vpop.permute.xlu2 %922  ;;  %v1955_v42 = vmov 49  }
 0x163   : > { %1752 = vset.pattern.permute.xlu1 %v1920_v27  ;;  %v1953_v27 = vmov 48  }
 0x164   : > { %1086 = vperm.xlu1 %1752, %v2221_v53  }
 0x169   : > { %1224 = vperm.xlu0 %1765, %v2221_v53   ;;  %1096 = vperm.xlu2 %1753, %v2221_v53  }
 0x16a   : > { %v2406_v35 = vpop.permute.xlu2 %960 }
 0x16c   : > { %1755 = vset.pattern.permute.xlu1 %v1922_v29  ;;  %v2401_v29 = vpop.permute.xlu1 %892 }
 0x16d   : > { %1116 = vperm.xlu1 %1755, %v2221_v53  }
 0x16f   : > { %v2428_v1 = vpop.permute.xlu0 %932 }
 0x171   : > { %1273 = vrot.lane.b32.xlu0 %v2350_v51, %s1933_s28  ;;  %1756 = vset.pattern.permute.xlu2 %v1952_v24 }
 0x172   : > { %1126 = vperm.xlu2 %1756, %v2221_v53   ;;  %1771 = vset.pattern.permute.xlu0 %v1927_v38 }
 0x174   : > { %v2413_v38 = vpop.permute.xlu1 %912 }
 0x175   : > { %1757 = vset.pattern.permute.xlu1 %v1953_v27 }
 0x176   : > { %1136 = vperm.xlu1 %1757, %v2221_v53  }
 0x178   : > { %v2435_v60 = vpop.permute.xlu0 %970 }
 0x179   : > { %1292 = vperm.xlu0 %1771, %v2221_v53  }
 0x17a   : > { %1758 = vset.pattern.permute.xlu2 %v1923_v30  ;;  %v1954_v30 = vmov 40  }
 0x17b   : > { %1146 = vperm.xlu2 %1758, %v2221_v53  }
 0x17e   : > { %1760 = vset.pattern.permute.xlu1 %v1926_v36  ;;  %v2417_v36 = vpop.permute.xlu2 %990 }
 0x17f   : > { %1166 = vperm.xlu1 %1760, %v2221_v53  }
 0x181   : > { %1341 = vrot.lane.b32.xlu0 %v2350_v51, %s1939_s30 }
 0x182   : > { %1777 = vset.pattern.permute.xlu0 %v1940_v6  ;;  %v2421_v6 = vpop.permute.xlu1 %950 }
 0x183   : > { %1761 = vset.pattern.permute.xlu2 %v1921_v28 }
 0x184   : > { %1176 = vperm.xlu2 %1761, %v2221_v53  }
 0x187   : > { %1762 = vset.pattern.permute.xlu1 %v1954_v30 }
 0x188   : > { %1186 = vperm.xlu1 %1762, %v2221_v53  }
 0x189   : > { %1360 = vperm.xlu0 %1777, %v2221_v53  }
 0x18a   : > { %v2430_v55 = vpop.permute.xlu1 %980 }
 0x18c   : > { %1763 = vset.pattern.permute.xlu2 %v1955_v42 }
 0x18d   : > { %1196 = vperm.xlu2 %1763, %v2221_v53  }
 0x190   : > { %1207 = vrot.lane.b32.xlu1 %v2352_v10, %s1928_s27 }
 0x191   : > { %1766 = vset.pattern.permute.xlu1 %v1924_v34 }
 0x192   : > { %v874_v28 = vpop.permute.xlu2 %873  ;;  %v2438_v34 = vpop.permute.xlu1 %1000 }
 0x195   : > { %1764 = vset.pattern.permute.xlu2 %v2710_v22  ;;  %v2717_v22 = vmov 6  }
 0x196   : > { %1214 = vperm.xlu2 %1764, %v2221_v53  }
 0x198   : > { %1234 = vperm.xlu1 %1766, %v2221_v53  }
 0x19a   : > { %v944_v37 = vpop.permute.xlu2 %943 }
 0x19e   : > { %1767 = vset.pattern.permute.xlu2 %v2711_v47 }
 0x19f   : > { %1244 = vperm.xlu2 %1767, %v2221_v53  }
 0x1a0   : > { %1768 = vset.pattern.permute.xlu1 %v1956_v57 }
 0x1a1   : > { %1254 = vperm.xlu1 %1768, %v2221_v53  }
 0x1a2   : > { %v1010_v5 = vpop.permute.xlu2 %1009 }
 0x1a7   : > { %1769 = vset.pattern.permute.xlu2 %v1957_v33 }
 0x1a8   : > { %1264 = vperm.xlu2 %1769, %v2221_v53  }
 0x1a9   : > { %1275 = vrot.lane.b32.xlu1 %v2352_v10, %s1933_s28 }
 0x1aa   : > { %v1012_v32 = vpop.permute.xlu0 %1011  ;;  %v1029_v43 = vpop.permute.xlu2 %1028  ;;  %1772 = vset.pattern.permute.xlu1 %v2712_v0 }
 0x1ab   : > { %v1013_v7 = vsel %vm436_vm2, %v1010_v5, %v1012_v32  ;;  %v1014_v11 = vsel %vm436_vm2, %v1012_v32, %v1010_v5  ;;  %v872_v17 = vpop.permute.xlu1 %871 }
 0x1ac   : > { %v2450_v41 = vmul.f32 %v1014_v11, %v2713_v4  ;;  %v2454_v58 = vmul.f32 %v1013_v7, %v2714_v3  ;;  %v875_v20 = vsel %vm311_vm0, %v872_v17, %v874_v28  ;;  %v876_v2 = vsel %vm311_vm0, %v874_v28, %v872_v17 }
 0x1ad   : > { %v877_v18 = vmul.f32 %v876_v2, %v2715_v21  ;;  %v878_v15 = vmul.f32 %v875_v20, %v2716_v19 }
 0x1ae   : > { %v1031_v46 = vperm.slane %v2450_v41, 1  ;;  %v1032_v54 = vperm.slane %v2454_v58, 1 }
 0x1af   : > { %v885_v16 = vperm.slane %v877_v18, 0  ;;  %v886_v50 = vperm.slane %v878_v15, 0  ;;  %v895_v31 = vperm.slane %v877_v18, 1  ;;  %v896_v52 = vperm.slane %v878_v15, 1 }
 0x1b0   : > { %v905_v24 = vperm.slane %v877_v18, 2  ;;  %v906_v27 = vperm.slane %v878_v15, 2  ;;  %v915_v30 = vperm.slane %v877_v18, 3  ;;  %v916_v42 = vperm.slane %v878_v15, 3  ;;  %1770 = vset.pattern.permute.xlu2 %v2717_v22 }
 0x1b1   : > { %v887_v28 = vmul.f32 %v885_v16, %v883_v40  ;;  %v888_v47 = vmul.f32 %v886_v50, %v883_v40  ;;  %v897_v57 = vmul.f32 %v895_v31, %v2401_v29  ;;  %v898_v63 = vmul.f32 %v896_v52, %v2401_v29  ;;  %1302 = vperm.xlu1 %1772, %v2221_v53  }
 0x1b2   : > { %v907_v5 = vmul.f32 %v905_v24, %v2389_v23  ;;  %v908_v33 = vmul.f32 %v906_v27, %v2389_v23  ;;  %1282 = vperm.xlu2 %1770, %v2221_v53   ;;  %v925_v7 = vperm.slane %v877_v18, 4  ;;  %v926_v11 = vperm.slane %v878_v15, 4 }
 0x1b3   : > { %v899_v32 = vadd.f32 %v897_v57, %v887_v28  ;;  %v900_v0 = vadd.f32 %v898_v63, %v888_v47  ;;  %v942_v17 = vpop.permute.xlu1 %941  ;;  %v1059_v4 = vpop.permute.xlu2 %1058  ;;  %v935_v3 = vperm.slane %v877_v18, 5  ;;  %v936_v40 = vperm.slane %v878_v15, 5 }
 0x1b4   : > { %v2473_v20 = vmul.f32 %v1031_v46, %v1029_v43  ;;  %v2475_v2 = vmul.f32 %v1032_v54, %v1029_v43  ;;  %v917_v29 = vmul.f32 %v915_v30, %v2413_v38  ;;  %v918_v21 = vmul.f32 %v916_v42, %v2413_v38 }
 0x1b5   : > { %v945_v23 = vsel %vm373_vm1, %v942_v17, %v944_v37  ;;  %v946_v19 = vsel %vm373_vm1, %v944_v37, %v942_v17  ;;  %v2718_v16 = vperm.slane %v2134_v26, 0  ;;  %v2719_v18 = vperm.slane %v2134_v26, 1 }
 0x1b6   : > { %v1061_v46 = vperm.slane %v2450_v41, 4  ;;  %v1062_v43 = vperm.slane %v2454_v58, 4  ;;  %v909_v54 = vadd.f32 %v907_v5, %v899_v32  ;;  %v910_v31 = vadd.f32 %v908_v33, %v900_v0 }
 0x1b7   : > { %v947_v50 = vmul.f32 %v946_v19, %v2718_v16  ;;  %v948_v15 = vmul.f32 %v945_v23, %v2719_v18  ;;  %v927_v38 = vmul.f32 %v925_v7, %v2397_v25  ;;  %v928_v52 = vmul.f32 %v926_v11, %v2397_v25 }
 0x1b8   : > { %v2491_v24 = vmul.f32 %v1061_v46, %v1059_v4  ;;  %v2493_v27 = vmul.f32 %v1062_v43, %v1059_v4  ;;  %v937_v37 = vmul.f32 %v935_v3, %v2428_v1  ;;  %v938_v30 = vmul.f32 %v936_v40, %v2428_v1 }
 0x1b9   : > { %v1958_v26 = vmov 42   ;;  %v919_v42 = vadd.f32 %v917_v29, %v909_v54  ;;  %v920_v22 = vadd.f32 %v918_v21, %v910_v31  ;;  %v953_v28 = vperm.slane %v947_v50, 0 }
 0x1ba   : > { %1774 = vset.pattern.permute.xlu1 %v1958_v26  ;;  %v954_v47 = vperm.slane %v948_v15, 0  ;;  %v2720_v57 = vmov 33   ;;  %v963_v63 = vperm.slane %v947_v50, 1  ;;  %v964_v25 = vperm.slane %v948_v15, 1 }
 0x1bb   : > { %1773 = vset.pattern.permute.xlu2 %v2720_v57  ;;  %1322 = vperm.xlu1 %1774, %v2221_v53   ;;  %v973_v5 = vperm.slane %v947_v50, 2  ;;  %v974_v33 = vperm.slane %v948_v15, 2  ;;  %v1019_v32 = vpop.permute.xlu1 %1018  ;;  %v929_v0 = vadd.f32 %v927_v38, %v919_v42  ;;  %v930_v7 = vadd.f32 %v928_v52, %v920_v22  ;;  %v2502_v17 = vpop.permute.xlu2 %1077 }
 0x1bc   : > { %1312 = vperm.xlu2 %1773, %v2221_v53   ;;  %v955_v1 = vmul.f32 %v953_v28, %v2421_v6  ;;  %v956_v11 = vmul.f32 %v954_v47, %v2421_v6  ;;  %v965_v4 = vmul.f32 %v963_v63, %v2406_v35  ;;  %v966_v3 = vmul.f32 %v964_v25, %v2406_v35 }
 0x1bd   : > { %v975_v40 = vmul.f32 %v973_v5, %v2435_v60  ;;  %v976_v29 = vmul.f32 %v974_v33, %v2435_v60  ;;  %v939_v21 = vadd.f32 %v937_v37, %v929_v0  ;;  %v940_v23 = vadd.f32 %v938_v30, %v930_v7 }
 0x1be   : > { %v983_v19 = vperm.slane %v947_v50, 3  ;;  %v984_v16 = vperm.slane %v948_v15, 3  ;;  %v993_v18 = vperm.slane %v947_v50, 4  ;;  %v994_v46 = vperm.slane %v948_v15, 4 }
 0x1bf   : > { %v1003_v43 = vperm.slane %v947_v50, 5  ;;  %v1004_v54 = vperm.slane %v948_v15, 5  ;;  %v957_v31 = vadd.f32 %v955_v1, %v939_v21  ;;  %v958_v6 = vadd.f32 %v956_v11, %v940_v23 }
 0x1c0   : > { %v985_v38 = vmul.f32 %v983_v19, %v2430_v55  ;;  %v986_v52 = vmul.f32 %v984_v16, %v2430_v55  ;;  %v995_v35 = vmul.f32 %v993_v18, %v2417_v36  ;;  %v996_v26 = vmul.f32 %v994_v46, %v2417_v36 }
 0x1c1   : > { %v1005_v60 = vmul.f32 %v1003_v43, %v2438_v34  ;;  %v1006_v37 = vmul.f32 %v1004_v54, %v2438_v34  ;;  %v967_v30 = vadd.f32 %v965_v4, %v957_v31  ;;  %v968_v42 = vadd.f32 %v966_v3, %v958_v6 }
 0x1c2   : > { %v1021_v22 = vperm.slane %v2450_v41, 0  ;;  %v1022_v50 = vperm.slane %v2454_v58, 0  ;;  %v1051_v15 = vperm.slane %v2450_v41, 3  ;;  %v1052_v55 = vperm.slane %v2454_v58, 3 }
 0x1c3   : > { %1343 = vrot.lane.b32.xlu1 %v2352_v10, %s1939_s30  ;;  %v977_v28 = vadd.f32 %v975_v40, %v967_v30  ;;  %v978_v47 = vadd.f32 %v976_v29, %v968_v42  ;;  %v1959_v63 = vmov 51   ;;  %v2520_v34 = vpop.permute.xlu2 %1096  ;;  %v2721_v5 = vmov 25   ;;  %v1039_v29 = vpop.permute.xlu0 %1038 }
 0x1c4   : > { %v1023_v36 = vmul.f32 %v1021_v22, %v1019_v32  ;;  %v1024_v57 = vmul.f32 %v1022_v50, %v1019_v32  ;;  %1775 = vset.pattern.permute.xlu2 %v1959_v63  ;;  %v1049_v25 = vpop.permute.xlu1 %1048  ;;  %1778 = vset.pattern.permute.xlu1 %v2721_v5  ;;  %v1960_v11 = vmov 43   ;;  %v1041_v21 = vperm.slane %v2450_v41, 2 }
 0x1c5   : > { %1332 = vperm.xlu2 %1775, %v2221_v53   ;;  %v987_v33 = vadd.f32 %v985_v38, %v977_v28  ;;  %v988_v0 = vadd.f32 %v986_v52, %v978_v47  ;;  %v1053_v7 = vmul.f32 %v1051_v15, %v1049_v25  ;;  %v1054_v1 = vmul.f32 %v1052_v55, %v1049_v25 }
 0x1c6   : > { %1780 = vset.pattern.permute.xlu0 %v1960_v11  ;;  %v1042_v23 = vperm.slane %v2454_v58, 2  ;;  %v2722_v18 = vmov 7   ;;  %v1071_v46 = vperm.slane %v2450_v41, 5  ;;  %v1072_v43 = vperm.slane %v2454_v58, 5 }
 0x1c7   : > { %1390 = vperm.xlu0 %1780, %v2221_v53   ;;  %v997_v4 = vadd.f32 %v995_v35, %v987_v33  ;;  %v998_v3 = vadd.f32 %v996_v26, %v988_v0  ;;  %v1043_v54 = vmul.f32 %v1041_v21, %v1039_v29  ;;  %v1961_v22 = vmov 52  }
 0x1c8   : > { %v1044_v31 = vmul.f32 %v1042_v23, %v1039_v29  ;;  %v2724_v55 = vmov 34   ;;  %v2727_v25 = vmov 17   ;;  %v2728_v0 = vperm.slane %v2197_v61, 0 }
 0x1c9   : > { %v1007_v32 = vadd.f32 %v1005_v60, %v997_v4  ;;  %v1008_v40 = vadd.f32 %v1006_v37, %v998_v3  ;;  %v2723_v37 = vmov 35  }
 0x1cb   : > { %1370 = vperm.xlu1 %1778, %v2221_v53   ;;  %v1025_v19 = vadd.f32 %v1023_v36, %v1007_v32  ;;  %v1026_v16 = vadd.f32 %v1024_v57, %v1008_v40  ;;  %v2725_v36 = vmov 0   ;;  %v1080_v63 = vpop.permute.xlu0 %1079  ;;  %v1962_v32 = vmov 44  }
 0x1cc   : > { %v2534_v35 = vpop.permute.xlu2 %1126  ;;  %v1081_v5 = vsel %vm499_vm3, %v2502_v17, %v1080_v63  ;;  %v1082_v33 = vsel %vm499_vm3, %v1080_v63, %v2502_v17  ;;  %v2730_v17 = vmov 26  }
 0x1cd   : > { %1776 = vset.pattern.permute.xlu2 %v2722_v18  ;;  %v1035_v6 = vadd.f32 %v2473_v20, %v1025_v19  ;;  %v1036_v38 = vadd.f32 %v2475_v2, %v1026_v16  ;;  %v1069_v52 = vpop.permute.xlu1 %1068 }
 0x1ce   : > { %1350 = vperm.xlu2 %1776, %v2221_v53   ;;  %v1073_v26 = vmul.f32 %v1071_v46, %v1069_v52  ;;  %v1074_v60 = vmul.f32 %v1072_v43, %v1069_v52  ;;  %v1477_v43 = vld [vmem:[%s2684_s4] sm:$0x3f] }
 0x1cf   : > { %1785 = vset.pattern.permute.xlu0 %v2723_v37  ;;  %v1045_v30 = vadd.f32 %v1043_v54, %v1035_v6  ;;  %v1046_v42 = vadd.f32 %v1044_v31, %v1036_v38 }
 0x1d0   : > { %1448 = vperm.xlu0 %1785, %v2221_v53  }
 0x1d1   : > { %v1055_v41 = vadd.f32 %v1053_v7, %v1045_v30  ;;  %v1056_v58 = vadd.f32 %v1054_v1, %v1046_v42  ;;  %v1083_v7 = vmul.f32 %v1082_v33, %v2728_v0  ;;  %v2729_v1 = vperm.slane %v2197_v61, 1 }
 0x1d2   : > { %v1963_v42 = vmov 53  }
 0x1d3   : > { %1409 = vrot.lane.b32.xlu1 %v2350_v51, %s1936_s29  ;;  %v1065_v20 = vadd.f32 %v2491_v24, %v1055_v41  ;;  %v1066_v2 = vadd.f32 %v2493_v27, %v1056_v58  ;;  %v2726_v27 = vmov 8   ;;  %v1084_v11 = vmul.f32 %v1081_v5, %v2729_v1  ;;  %v1107_v31 = vpop.permute.xlu0 %1106 }
 0x1d4   : > { %1781 = vset.pattern.permute.xlu1 %v1961_v22  ;;  %v1089_v40 = vperm.slane %v1083_v7, 0  ;;  %v1099_v16 = vperm.slane %v1083_v7, 1  ;;  %v1109_v52 = vperm.slane %v1083_v7, 2  ;;  %v1119_v37 = vperm.slane %v1083_v7, 3  ;;  %v1790_v22 = vld [vmem:[#allocation4] sm:$0x3f] }
 0x1d5   : > { %v1075_v50 = vadd.f32 %v1073_v26, %v1065_v20  ;;  %v1076_v15 = vadd.f32 %v1074_v60, %v1066_v2  ;;  %v2544_v47 = vpop.permute.xlu2 %1146  ;;  %v1090_v29 = vperm.slane %v1084_v11, 0  ;;  %v1100_v18 = vperm.slane %v1084_v11, 1 }
 0x1d6   : > { %1779 = vset.pattern.permute.xlu2 %v2724_v55  ;;  %v1087_v28 = vpop.permute.xlu1 %1086  ;;  %v1101_v6 = vmul.f32 %v1099_v16, %v2520_v34  ;;  %v1120_v30 = vperm.slane %v1084_v11, 3  ;;  %v1111_v41 = vmul.f32 %v1109_v52, %v1107_v31  ;;  %v1129_v55 = vperm.slane %v1083_v7, 4 }
 0x1d7   : > { %1380 = vperm.xlu2 %1779, %v2221_v53   ;;  %v1091_v21 = vmul.f32 %v1089_v40, %v1087_v28  ;;  %v1092_v23 = vmul.f32 %v1090_v29, %v1087_v28  ;;  %v1102_v38 = vmul.f32 %v1100_v18, %v2520_v34  ;;  %v1130_v28 = vperm.slane %v1084_v11, 4 }
 0x1d8   : > { %1789 = vset.pattern.permute.xlu0 %v2725_v36  ;;  %v1139_v63 = vperm.slane %v1083_v7, 5  ;;  %v1131_v0 = vmul.f32 %v1129_v55, %v2534_v35 }
 0x1d9   : > { %v1093_v61 = vadd.f32 %v1091_v21, %v1075_v50  ;;  %v1094_v46 = vadd.f32 %v1092_v23, %v1076_v15  ;;  %v1132_v1 = vmul.f32 %v1130_v28, %v2534_v35  ;;  %v1149_v21 = vperm.slane %v2350_v51, 0 }
 0x1da   : > { %v1150_v23 = vperm.slane %v2352_v10, 0 }
 0x1db   : > { %1400 = vperm.xlu1 %1781, %v2221_v53   ;;  %v1103_v26 = vadd.f32 %v1101_v6, %v1093_v61  ;;  %v1104_v60 = vadd.f32 %v1102_v38, %v1094_v46  ;;  %v1157_v33 = vpop.permute.xlu0 %1156  ;;  %v1151_v7 = vmul.f32 %v1149_v21, %v2544_v47  ;;  %v1159_v61 = vperm.slane %v2350_v51, 1 }
 0x1dc   : > { %v1160_v46 = vperm.slane %v2352_v10, 1 }
 0x1dd   : > { %v1113_v50 = vadd.f32 %v1111_v41, %v1103_v26  ;;  %v1161_v38 = vmul.f32 %v1159_v61, %v1157_v33 }
 0x1de   : > { %v2551_v57 = vpop.permute.xlu2 %1176  ;;  %v1162_v52 = vmul.f32 %v1160_v46, %v1157_v33 }
 0x1df   : > { %1411 = vrot.lane.b32.xlu2 %v2352_v10, %s1936_s29  ;;  %v1117_v24 = vpop.permute.xlu1 %1116 }
 0x1e0   : > { %1782 = vset.pattern.permute.xlu2 %v2726_v27  ;;  %v1121_v20 = vmul.f32 %v1119_v37, %v1117_v24  ;;  %v1122_v2 = vmul.f32 %v1120_v30, %v1117_v24 }
 0x1e3   : > { %1783 = vset.pattern.permute.xlu1 %v2727_v25  ;;  %v1140_v25 = vperm.slane %v1084_v11, 5 }
 0x1e4   : > { %1428 = vperm.xlu1 %1783, %v2221_v53  }
 0x1e7   : > { %1418 = vperm.xlu2 %1782, %v2221_v53   ;;  %v2566_v3 = vpop.permute.xlu2 %1196 }
 0x1e8   : > { %v1137_v4 = vpop.permute.xlu1 %1136 }
 0x1e9   : > { %v1142_v24 = vmul.f32 %v1140_v25, %v1137_v4 }
 0x1ec   : > { %1786 = vset.pattern.permute.xlu1 %v1962_v32  ;;  %v1141_v32 = vmul.f32 %v1139_v63, %v1137_v4  ;;  %v1170_v4 = vperm.slane %v2352_v10, 2 }
 0x1ed   : > { %1458 = vperm.xlu1 %1786, %v2221_v53  }
 0x1ef   : > { %1784 = vset.pattern.permute.xlu2 %v2730_v17 }
 0x1f0   : > { %1438 = vperm.xlu2 %1784, %v2221_v53   ;;  %v2574_v54 = vpop.permute.xlu2 %1214  ;;  %v1110_v53 = vperm.slane %v1084_v11, 2  ;;  %v1152_v11 = vmul.f32 %v1150_v23, %v2544_v47 }
 0x1f1   : > { %v1167_v19 = vpop.permute.xlu1 %1166 }
 0x1f2   : > { %v1112_v58 = vmul.f32 %v1110_v53, %v1107_v31  ;;  %v1169_v31 = vperm.slane %v2350_v51, 2  ;;  %v1206_v53 = vpop.permute.xlu0 %1205 }
 0x1f4   : > { %v1114_v15 = vadd.f32 %v1112_v58, %v1104_v60  ;;  %v1171_v26 = vmul.f32 %v1169_v31, %v1167_v19  ;;  %v1172_v60 = vmul.f32 %v1170_v4, %v1167_v19  ;;  %v1179_v58 = vperm.slane %v2350_v51, 3 }
 0x1f5   : > { %1788 = vset.pattern.permute.xlu1 %v2725_v36  ;;  %v1123_v36 = vadd.f32 %v1121_v20, %v1113_v50  ;;  %v1180_v20 = vperm.slane %v2352_v10, 3 }
 0x1f6   : > { %1480 = vperm.xlu1 %1788, %v1477_v43   ;;  %v1124_v27 = vadd.f32 %v1122_v2, %v1114_v15  ;;  %v1190_v2 = vperm.slane %v2352_v10, 4  ;;  %v1181_v28 = vmul.f32 %v1179_v58, %v2551_v57 }
 0x1f7   : > { %v1133_v40 = vadd.f32 %v1131_v0, %v1123_v36  ;;  %v1182_v36 = vmul.f32 %v1180_v20, %v2551_v57  ;;  %v1202_v57 = vmul.f32 %v1200_v14, %v2566_v3 }
 0x1f8   : > { %1787 = vset.pattern.permute.xlu2 %v1963_v42  ;;  %v1134_v29 = vadd.f32 %v1132_v1, %v1124_v27 }
 0x1f9   : > { %1468 = vperm.xlu2 %1787, %v1790_v22   ;;  %v2579_v5 = vpop.permute.xlu2 %1244  ;;  %v1143_v17 = vadd.f32 %v1141_v32, %v1133_v40  ;;  %v1189_v22 = vperm.slane %v2350_v51, 4 }
 0x1fa   : > { %v1187_v34 = vpop.permute.xlu1 %1186  ;;  %v1144_v16 = vadd.f32 %v1142_v24, %v1134_v29  ;;  %v1225_v24 = vpop.permute.xlu0 %1224 }
 0x1fb   : > { %v1153_v35 = vadd.f32 %v1151_v7, %v1143_v17  ;;  %v1191_v27 = vmul.f32 %v1189_v22, %v1187_v34  ;;  %v1192_v63 = vmul.f32 %v1190_v2, %v1187_v34 }
 0x1fc   : > { %v1154_v43 = vadd.f32 %v1152_v11, %v1144_v16 }
 0x1fd   : > { %v1163_v30 = vadd.f32 %v1161_v38, %v1153_v35 }
 0x1fe   : > { %v1164_v42 = vadd.f32 %v1162_v52, %v1154_v43 }
 0x1ff   : > { %v1173_v50 = vadd.f32 %v1171_v26, %v1163_v30 }
 0x200   : > { %v1174_v15 = vadd.f32 %v1172_v60, %v1164_v42 }
 0x201   : > { %v1183_v25 = vadd.f32 %v1181_v28, %v1173_v50 }
 0x202   : > { %v1208_v18 = vpop.permute.xlu1 %1207  ;;  %v2591_v6 = vpop.permute.xlu2 %1264  ;;  %v1184_v33 = vadd.f32 %v1182_v36, %v1174_v15 }
 0x203   : > { %v1209_v47 = vsel %vm618_vm4, %v1206_v53, %v1208_v18  ;;  %v1210_v37 = vsel %vm618_vm4, %v1208_v18, %v1206_v53  ;;  %v1274_v4 = vpop.permute.xlu0 %1273 }
 0x204   : > { %v2603_v19 = vmul.f32 %v1209_v47, %v624_v8  ;;  %v2607_v55 = vmul.f32 %v1210_v37, %v625_v9  ;;  %v1199_v8 = vperm.slane %v2350_v51, 5  ;;  %v1193_v9 = vadd.f32 %v1191_v27, %v1183_v25 }
 0x205   : > { %v1194_v40 = vadd.f32 %v1192_v63, %v1184_v33 }
 0x206   : > { %v1217_v0 = vperm.slane %v2603_v19, 0  ;;  %v1218_v1 = vperm.slane %v2607_v55, 0  ;;  %v1201_v21 = vmul.f32 %v1199_v8, %v2566_v3  ;;  %v1227_v18 = vperm.slane %v2603_v19, 1 }
 0x207   : > { %v1204_v16 = vadd.f32 %v1202_v57, %v1194_v40  ;;  %v1228_v7 = vperm.slane %v2607_v55, 1  ;;  %v1237_v46 = vperm.slane %v2603_v19, 2  ;;  %v1238_v35 = vperm.slane %v2607_v55, 2 }
 0x208   : > { %v1219_v34 = vmul.f32 %v1217_v0, %v2574_v54  ;;  %v1220_v23 = vmul.f32 %v1218_v1, %v2574_v54  ;;  %v1203_v17 = vadd.f32 %v1201_v21, %v1193_v9  ;;  %v1229_v10 = vmul.f32 %v1227_v18, %v1225_v24 }
 0x209   : > { %v1230_v61 = vmul.f32 %v1228_v7, %v1225_v24  ;;  %v1247_v60 = vperm.slane %v2603_v19, 3  ;;  %v1248_v47 = vperm.slane %v2607_v55, 3  ;;  %v1257_v37 = vperm.slane %v2603_v19, 4 }
 0x20a   : > { %v1235_v41 = vpop.permute.xlu1 %1234  ;;  %v1221_v51 = vadd.f32 %v1219_v34, %v1203_v17  ;;  %v1222_v11 = vadd.f32 %v1220_v23, %v1204_v16  ;;  %v1258_v30 = vperm.slane %v2607_v55, 4  ;;  %v1267_v28 = vperm.slane %v2603_v19, 5 }
 0x20b   : > { %v1239_v54 = vmul.f32 %v1237_v46, %v1235_v41  ;;  %v1240_v52 = vmul.f32 %v1238_v35, %v1235_v41  ;;  %v1249_v2 = vmul.f32 %v1247_v60, %v2579_v5  ;;  %v1250_v22 = vmul.f32 %v1248_v47, %v2579_v5  ;;  %v1293_v14 = vpop.permute.xlu0 %1292 }
 0x20c   : > { %v1283_v32 = vpop.permute.xlu2 %1282  ;;  %v1231_v31 = vadd.f32 %v1229_v10, %v1221_v51  ;;  %v1232_v38 = vadd.f32 %v1230_v61, %v1222_v11  ;;  %v1268_v36 = vperm.slane %v2607_v55, 5  ;;  %v1269_v1 = vmul.f32 %v1267_v28, %v2591_v6 }
 0x20e   : > { %v1241_v42 = vadd.f32 %v1239_v54, %v1231_v31  ;;  %v1242_v58 = vadd.f32 %v1240_v52, %v1232_v38  ;;  %v1270_v5 = vmul.f32 %v1268_v36, %v2591_v6 }
 0x210   : > { %v1251_v63 = vadd.f32 %v1249_v2, %v1241_v42  ;;  %v1252_v25 = vadd.f32 %v1250_v22, %v1242_v58 }
 0x213   : > { %v1255_v29 = vpop.permute.xlu1 %1254  ;;  %v1342_v61 = vpop.permute.xlu0 %1341 }
 0x214   : > { %v1259_v50 = vmul.f32 %v1257_v37, %v1255_v29  ;;  %v1260_v15 = vmul.f32 %v1258_v30, %v1255_v29 }
 0x216   : > { %v1313_v43 = vpop.permute.xlu2 %1312  ;;  %v1262_v0 = vadd.f32 %v1260_v15, %v1252_v25 }
 0x218   : > { %v1272_v9 = vadd.f32 %v1270_v5, %v1262_v0 }
 0x21b   : > { %v1276_v3 = vpop.permute.xlu1 %1275  ;;  %v1361_v0 = vpop.permute.xlu0 %1360 }
 0x21c   : > { %v1277_v53 = vsel %vm681_vm5, %v1274_v4, %v1276_v3  ;;  %v1278_v26 = vsel %vm681_vm5, %v1276_v3, %v1274_v4 }
 0x21d   : > { %v2633_v20 = vmul.f32 %v1277_v53, %v687_v13  ;;  %v2637_v41 = vmul.f32 %v1278_v26, %v688_v56  ;;  %v1261_v56 = vadd.f32 %v1259_v50, %v1251_v63 }
 0x21f   : > { %v1285_v13 = vperm.slane %v2633_v20, 0  ;;  %v1286_v33 = vperm.slane %v2637_v41, 0  ;;  %v1333_v44 = vpop.permute.xlu2 %1332  ;;  %v1271_v19 = vadd.f32 %v1269_v1, %v1261_v56  ;;  %v1295_v55 = vperm.slane %v2633_v20, 1 }
 0x220   : > { %v1296_v40 = vperm.slane %v2637_v41, 1  ;;  %v1305_v17 = vperm.slane %v2633_v20, 2  ;;  %v1306_v16 = vperm.slane %v2637_v41, 2  ;;  %v1315_v11 = vperm.slane %v2633_v20, 3 }
 0x221   : > { %v1287_v24 = vmul.f32 %v1285_v13, %v1283_v32  ;;  %v1288_v8 = vmul.f32 %v1286_v33, %v1283_v32  ;;  %v1297_v34 = vmul.f32 %v1295_v55, %v1293_v14  ;;  %v1316_v10 = vperm.slane %v2637_v41, 3 }
 0x222   : > { %v1298_v23 = vmul.f32 %v1296_v40, %v1293_v14  ;;  %v1325_v3 = vperm.slane %v2633_v20, 4  ;;  %v1326_v4 = vperm.slane %v2637_v41, 4  ;;  %v1317_v38 = vmul.f32 %v1315_v11, %v1313_v43 }
 0x223   : > { %v1303_v27 = vpop.permute.xlu1 %1302  ;;  %v1289_v29 = vadd.f32 %v1287_v24, %v1271_v19  ;;  %v1290_v21 = vadd.f32 %v1288_v8, %v1272_v9  ;;  %v1318_v54 = vmul.f32 %v1316_v10, %v1313_v43  ;;  %v1335_v30 = vperm.slane %v2633_v20, 5 }
 0x224   : > { %v1307_v32 = vmul.f32 %v1305_v17, %v1303_v27  ;;  %v1308_v51 = vmul.f32 %v1306_v16, %v1303_v27  ;;  %v1336_v42 = vperm.slane %v2637_v41, 5 }
 0x225   : > { %v1299_v6 = vadd.f32 %v1297_v34, %v1289_v29  ;;  %v1300_v7 = vadd.f32 %v1298_v23, %v1290_v21  ;;  %v1337_v36 = vmul.f32 %v1335_v30, %v1333_v44 }
 0x226   : > { %v1338_v27 = vmul.f32 %v1336_v42, %v1333_v44 }
 0x227   : > { %v1309_v46 = vadd.f32 %v1307_v32, %v1299_v6  ;;  %v1310_v35 = vadd.f32 %v1308_v51, %v1300_v7 }
 0x228   : > { %v1351_v18 = vpop.permute.xlu2 %1350 }
 0x229   : > { %v1319_v58 = vadd.f32 %v1317_v38, %v1309_v46  ;;  %v1320_v43 = vadd.f32 %v1318_v54, %v1310_v35 }
 0x22d   : > { %v1323_v57 = vpop.permute.xlu1 %1322 }
 0x22e   : > { %v1327_v26 = vmul.f32 %v1325_v3, %v1323_v57  ;;  %v1328_v60 = vmul.f32 %v1326_v4, %v1323_v57 }
 0x230   : > { %v1329_v15 = vadd.f32 %v1327_v26, %v1319_v58  ;;  %v1330_v28 = vadd.f32 %v1328_v60, %v1320_v43 }
 0x231   : > { %v1381_v50 = vpop.permute.xlu2 %1380 }
 0x232   : > { %v1340_v33 = vadd.f32 %v1338_v27, %v1330_v28 }
 0x235   : > { %v1344_v31 = vpop.permute.xlu1 %1343 }
 0x236   : > { %v1345_v52 = vsel %vm744_vm6, %v1342_v61, %v1344_v31  ;;  %v1346_v53 = vsel %vm744_vm6, %v1344_v31, %v1342_v61 }
 0x237   : > { %v1347_v47 = vmul.f32 %v1345_v52, %v750_v48  ;;  %v1348_v37 = vmul.f32 %v1346_v53, %v751_v45  ;;  %v1339_v48 = vadd.f32 %v1337_v36, %v1329_v15 }
 0x239   : > { %v1353_v2 = vperm.slane %v1347_v47, 0  ;;  %v1354_v22 = vperm.slane %v1348_v37, 0  ;;  %v1363_v59 = vperm.slane %v1347_v47, 1  ;;  %v1364_v45 = vperm.slane %v1348_v37, 1  ;;  %v1412_v8 = vpop.permute.xlu2 %1411  ;;  %v1391_v7 = vpop.permute.xlu0 %1390 }
 0x23a   : > { %v1373_v5 = vperm.slane %v1347_v47, 2  ;;  %v1374_v24 = vperm.slane %v1348_v37, 2  ;;  %v1383_v40 = vperm.slane %v1347_v47, 3  ;;  %v1384_v29 = vperm.slane %v1348_v37, 3 }
 0x23b   : > { %v1355_v25 = vmul.f32 %v1353_v2, %v1351_v18  ;;  %v1356_v13 = vmul.f32 %v1354_v22, %v1351_v18  ;;  %v1365_v41 = vmul.f32 %v1363_v59, %v1361_v0  ;;  %v1366_v1 = vmul.f32 %v1364_v45, %v1361_v0 }
 0x23c   : > { %v1393_v17 = vperm.slane %v1347_v47, 4  ;;  %v1394_v16 = vperm.slane %v1348_v37, 4  ;;  %v1385_v18 = vmul.f32 %v1383_v40, %v1381_v50  ;;  %v1386_v6 = vmul.f32 %v1384_v29, %v1381_v50 }
 0x23d   : > { %v1371_v63 = vpop.permute.xlu1 %1370  ;;  %v1357_v56 = vadd.f32 %v1355_v25, %v1339_v48  ;;  %v1358_v20 = vadd.f32 %v1356_v13, %v1340_v33  ;;  %v1403_v32 = vperm.slane %v1347_v47, 5  ;;  %v1404_v51 = vperm.slane %v1348_v37, 5 }
 0x23e   : > { %v1375_v9 = vmul.f32 %v1373_v5, %v1371_v63  ;;  %v1376_v55 = vmul.f32 %v1374_v24, %v1371_v63  ;;  %v1395_v4 = vmul.f32 %v1393_v17, %v1391_v7  ;;  %v1396_v62 = vmul.f32 %v1394_v16, %v1391_v7 }
 0x23f   : > { %v1367_v14 = vadd.f32 %v1365_v41, %v1357_v56  ;;  %v1368_v19 = vadd.f32 %v1366_v1, %v1358_v20 }
 0x241   : > { %v1377_v21 = vadd.f32 %v1375_v9, %v1367_v14  ;;  %v1378_v57 = vadd.f32 %v1376_v55, %v1368_v19  ;;  %v1419_v3 = vpop.permute.xlu2 %1418 }
 0x242   : > { %v1449_v48 = vpop.permute.xlu0 %1448 }
 0x243   : > { %v1387_v11 = vadd.f32 %v1385_v18, %v1377_v21  ;;  %v1388_v10 = vadd.f32 %v1386_v6, %v1378_v57 }
 0x245   : > { %v1410_v44 = vpop.permute.xlu1 %1409  ;;  %v1397_v54 = vadd.f32 %v1395_v4, %v1387_v11  ;;  %v1398_v52 = vadd.f32 %v1396_v62, %v1388_v10 }
 0x246   : > { %v1413_v34 = vsel %vm807_vm7, %v1410_v44, %v1412_v8  ;;  %v1414_v23 = vsel %vm807_vm7, %v1412_v8, %v1410_v44 }
 0x247   : > { %v1415_v61 = vmul.f32 %v1413_v34, %v813_v39  ;;  %v1416_v46 = vmul.f32 %v1414_v23, %v814_v49 }
 0x249   : > { %v1421_v53 = vperm.slane %v1415_v61, 0  ;;  %v1422_v26 = vperm.slane %v1416_v46, 0  ;;  %v1431_v42 = vperm.slane %v1415_v61, 1  ;;  %v1432_v58 = vperm.slane %v1416_v46, 1 }
 0x24a   : > { %v1441_v39 = vperm.slane %v1415_v61, 2  ;;  %v1442_v43 = vperm.slane %v1416_v46, 2  ;;  %v1439_v15 = vpop.permute.xlu2 %1438  ;;  %v1451_v27 = vperm.slane %v1415_v61, 3  ;;  %v1452_v63 = vperm.slane %v1416_v46, 3 }
 0x24b   : > { %v1423_v37 = vmul.f32 %v1421_v53, %v1419_v3  ;;  %v1424_v30 = vmul.f32 %v1422_v26, %v1419_v3  ;;  %v1461_v45 = vperm.slane %v1415_v61, 4  ;;  %v1462_v56 = vperm.slane %v1416_v46, 4 }
 0x24c   : > { %v1443_v25 = vmul.f32 %v1441_v39, %v1439_v15  ;;  %v1444_v13 = vmul.f32 %v1442_v43, %v1439_v15  ;;  %v1453_v20 = vmul.f32 %v1451_v27, %v1449_v48  ;;  %v1454_v0 = vmul.f32 %v1452_v63, %v1449_v48 }
 0x24d   : > { %v1401_v35 = vpop.permute.xlu1 %1400  ;;  %v1471_v19 = vperm.slane %v1415_v61, 5  ;;  %v1472_v9 = vperm.slane %v1416_v46, 5 }
 0x24e   : > { %v1405_v31 = vmul.f32 %v1403_v32, %v1401_v35  ;;  %v1406_v38 = vmul.f32 %v1404_v51, %v1401_v35 }
 0x250   : > { %v1407_v60 = vadd.f32 %v1405_v31, %v1397_v54  ;;  %v1408_v47 = vadd.f32 %v1406_v38, %v1398_v52 }
 0x252   : > { %v1425_v49 = vadd.f32 %v1423_v37, %v1407_v60  ;;  %v1426_v2 = vadd.f32 %v1424_v30, %v1408_v47 }
 0x253   : > { %v1469_v14 = vpop.permute.xlu2 %1468 }
 0x254   : > { %v1473_v40 = vmul.f32 %v1471_v19, %v1469_v14  ;;  %v1474_v29 = vmul.f32 %v1472_v9, %v1469_v14 }
 0x256   : > { %v1429_v12 = vpop.permute.xlu1 %1428 }
 0x257   : > { %v1433_v22 = vmul.f32 %v1431_v42, %v1429_v12  ;;  %v1434_v50 = vmul.f32 %v1432_v58, %v1429_v12 }
 0x259   : > { %v1435_v28 = vadd.f32 %v1433_v22, %v1425_v49  ;;  %v1436_v36 = vadd.f32 %v1434_v50, %v1426_v2 }
 0x25b   : > { %v1445_v33 = vadd.f32 %v1443_v25, %v1435_v28  ;;  %v1446_v59 = vadd.f32 %v1444_v13, %v1436_v36 }
 0x25d   : > { %v1455_v24 = vadd.f32 %v1453_v20, %v1445_v33  ;;  %v1456_v8 = vadd.f32 %v1454_v0, %v1446_v59 }
 0x25f   : > { %v1459_v41 = vpop.permute.xlu1 %1458 }
 0x260   : > { %v1463_v1 = vmul.f32 %v1461_v45, %v1459_v41  ;;  %v1464_v5 = vmul.f32 %v1462_v56, %v1459_v41 }
 0x262   : > { %v1465_v55 = vadd.f32 %v1463_v1, %v1455_v24  ;;  %v1466_v44 = vadd.f32 %v1464_v5, %v1456_v8 }
 0x264   : > { %v1475_v21 = vadd.f32 %v1473_v40, %v1465_v55  ;;  %v1476_v57 = vadd.f32 %v1474_v29, %v1466_v44 }
 0x268   : > { %v1481_v34 = vpop.permute.xlu1 %1480 }
 0x269   : > { %v1483_v23 = vadd.f32 %v1481_v34, %v1475_v21  ;;  %v1484_v17 = vadd.f32 %v1481_v34, %v1476_v57 }
 0x26b   : > { %v1485_v16 = vmax.f32 %v1483_v23, 0.0  ;;  %v1486_v18 = vmax.f32 %v1484_v17, 0.0 }
 0x26d   : > { %1487 = vst [vmem:[%s297_s14] sm:$0x3f] %v1485_v16 }
 0x26e   : > { %1488 = vst [vmem:[%s297_s14 + $0x8] sm:$0x3f] %v1486_v18 }
 0x26f PF: > { %s18_s21 = sadd.s32 1, %s1895_s21  }
 0x270   : > { %p15_p7 = scmp.ge.s32.totalorder %s18_s21, 4  }
 0x272   :  { %17 = sbr.rel (!%p15_p7) target bundleno = 2 (0x2), region = 94 }
 0x277   :  { %1510 = vsyncpa [#allocation3], 1 }
 0x278   :  { %1512 = vsyncpa [#allocation3 + $0x1], 1 }
 0x279   :  { %1513 = vsyncpa [#allocation5], 1 }

</bundles_post_ra>
